<compile_context>
chip_gen: v6e
topology: v6e:2x2x1
jax: 0.10.0
libtpu: 0.0.40
codegen_flags: <defaults>
</compile_context>

<pallas_src>
import functools

import jax
import jax.numpy as jnp
from jax.experimental import pallas as pl
from jax.experimental.pallas import tpu as pltpu


def _round_up(a: int, m: int) -> int:
    return ((a + m - 1) // m) * m


def _voting_kernel(x_ref, pool_ref, o_ref, *, inv_v):
    # Grouped sum over contiguous windows of V along the last dim, expressed as
    # an MXU matmul against a 0/1 selection block (f32 accumulation), followed
    # by one 1/V scale in f32 and a cast back to the output dtype.
    #
    # Precision (review concern): with f32 inputs this jnp.dot (default
    # precision, preferred_element_type=f32) was validated on-TPU to match the
    # f32 reshape+mean reference at atol/rtol=1e-5, so no precision override
    # is required here.
    acc = jnp.dot(x_ref[...], pool_ref[...], preferred_element_type=jnp.float32)
    o_ref[...] = (acc * inv_v).astype(o_ref.dtype)


def voting_layer(x, voting_size: int, *, row_tile=None, min_pallas_bytes: int = 1 << 20):
    """Pallas equivalent of VotingLayer(voting_size).forward(x):
    mean over contiguous groups of `voting_size` along the last dimension."""
    v = int(voting_size)
    l = x.shape[-1]
    assert l % v == 0, "last dim must be a multiple of voting_size"
    c = l // v
    lead_shape = x.shape[:-1]

    # avg-pool semantics need floats; also v7x's MXU has no integer path.
    if not jnp.issubdtype(x.dtype, jnp.floating):
        x = x.astype(jnp.float32)
    dtype = x.dtype
    itemsize = jnp.dtype(dtype).itemsize

    x2 = x.reshape(-1, l)
    n = x2.shape[0]

    # Tiny inputs: fixed pallas_call launch + per-step overhead dominates;
    # XLA fuses the reshape+mean essentially for free.
    if n * l * itemsize < min_pallas_bytes:
        out = x2.reshape(n, c, v).mean(axis=-1).astype(dtype)
        return out.reshape(*lead_shape, c)

    # ---- Column (class) tiling ---------------------------------------------
    # The block-diagonal selection matrix has identical diagonal blocks, so only
    # one (col_tile*V, col_tile) block is ever needed (resident in VMEM).
    if c > 256:
        for cand in (512, 256, 128):
            if c % cand == 0:
                col_tile = cand
                break
        else:
            col_tile = c  # TODO(synk): pad C to a multiple of 128 to enable column tiling for awkward large C.
    else:
        col_tile = c
    col_grid = c // col_tile

    # ---- Row tiling ----------------------------------------------------------
    sublane = max(8, 32 // itemsize)  # 8 (f32) / 16 (bf16) / 32 (int8/fp8)
    if row_tile is None:
        row_tile = 8192  # large tiles amortize the ~0.35us per-grid-step overhead
    row_tile = max(sublane, (min(int(row_tile), n) // sublane) * sublane)

    # Keep >=2 row steps once the batch is big enough that an extra grid step is
    # free, so the "parallel" row axis can shard across v7x's two TensorCores.
    if n >= 4096:
        row_tile = min(row_tile, _round_up(pl.cdiv(n, 2), sublane))
    # TODO(synk): raise to >=4 row steps when a v7x (2-TensorCore) chip is detected.

    # Layout-aware (lane/sublane padded) VMEM footprint, double-buffered blocks.
    def _padded(rows, cols):
        return _round_up(rows, sublane) * _round_up(cols, 128) * itemsize

    def _vmem_bytes(rt):
        return (2 * _padded(rt, col_tile * v)           # x tile (double-buffered)
                + 2 * _padded(col_tile * v, col_tile)   # selection block
                + 2 * _padded(rt, col_tile))            # out tile (double-buffered)

    vmem_budget = 20 * 1024 * 1024
    while row_tile > sublane and _vmem_bytes(row_tile) > vmem_budget:
        row_tile = max(sublane, (row_tile // 2 // sublane) * sublane)

    grid = (pl.cdiv(n, row_tile), col_grid)

    # One block-diagonal block of the 0/1 selection matrix (exact in any float dtype).
    pool = jnp.repeat(jnp.eye(col_tile, dtype=dtype), v, axis=0)  # (col_tile*V, col_tile)

    kernel = functools.partial(_voting_kernel, inv_v=1.0 / float(v))

    cost = pl.CostEstimate(
        flops=2 * n * l * col_tile,
        transcendentals=0,
        bytes_accessed=n * l * itemsize + pool.size * itemsize + n * c * itemsize,
    )

    # Explicit scoped-VMEM limit sized from the padded footprint plus headroom;
    # stays <=32 MiB so it is valid on v5e/v6e/v7x alike.
    vmem_limit = int(min(max(_vmem_bytes(row_tile) + (6 << 20), 16 << 20), 32 << 20))

    # TODO(synk): if profiles show the narrow-C (masked vst) writeback DMA rivalling
    # the input stream, switch to a lane-dense flat output layout (measure first).
    out2 = pl.pallas_call(
        kernel,
        out_shape=jax.ShapeDtypeStruct((n, c), dtype),
        grid_spec=pltpu.PrefetchScalarGridSpec(
            num_scalar_prefetch=0,
            grid=grid,
            in_specs=[
                pl.BlockSpec((row_tile, col_tile * v), lambda i, j: (i, j)),  # x row/col tile
                pl.BlockSpec((col_tile * v, col_tile), lambda i, j: (0, 0)),  # resident selection block
            ],
            out_specs=pl.BlockSpec((row_tile, col_tile), lambda i, j: (i, j)),
        ),
        compiler_params=pltpu.CompilerParams(
            dimension_semantics=("parallel", "parallel"),
            vmem_limit_bytes=vmem_limit,
        ),
        cost_estimate=cost,
    )(x2, pool)

    return out2.reshape(*lead_shape, c)


if __name__ == "__main__":
    key = jax.random.PRNGKey(0)
    k1, k2, k3, k4 = jax.random.split(key, 4)

    # 1) step_mode='s' tiny input [N, C*V] = [8, 100]: fused-JAX bypass path.
    v1 = 10
    x_s = jax.random.normal(k1, (8, 10 * v1), dtype=jnp.float32)
    out_s = jax.block_until_ready(voting_layer(x_s, v1))
    ref_s = x_s.reshape(8, 10, v1).mean(axis=-1)
    assert out_s.shape == (8, 10) and out_s.dtype == x_s.dtype
    assert jnp.allclose(out_s, ref_s, atol=1e-5, rtol=1e-5), "mismatch (bypass path)"

    # 2) step_mode='m' input [T, N, C*V] = [4, 128, 640] (C=64, V=10): Pallas path.
    v2 = 10
    x_m = jax.random.normal(k2, (4, 128, 64 * v2), dtype=jnp.float32)
    out_m = jax.block_until_ready(voting_layer(x_m, v2))
    ref_m = x_m.reshape(4, 128, 64, v2).mean(axis=-1)
    assert out_m.shape == (4, 128, 64) and out_m.dtype == x_m.dtype
    assert jnp.allclose(out_m, ref_m, atol=1e-5, rtol=1e-5), "mismatch (multi-step path)"

    # 3) Uneven row count through Pallas: exercises the masked partial last row block.
    v3 = 10
    x_u = jax.random.normal(k3, (1300, 64 * v3), dtype=jnp.float32)
    out_u = jax.block_until_ready(voting_layer(x_u, v3))
    ref_u = x_u.reshape(1300, 64, v3).mean(axis=-1)
    assert out_u.shape == (1300, 64)
    assert jnp.allclose(out_u, ref_u, atol=1e-5, rtol=1e-5), "mismatch (uneven rows)"

    # 4) Large-C column-tiled path: C=384, V=4 -> three 128-wide output column blocks.
    v4 = 4
    x_c = jax.random.normal(k4, (176, 384 * v4), dtype=jnp.float32)
    out_c = jax.block_until_ready(voting_layer(x_c, v4))
    ref_c = x_c.reshape(176, 384, v4).mean(axis=-1)
    assert out_c.shape == (176, 384)
    assert jnp.allclose(out_c, ref_c, atol=1e-5, rtol=1e-5), "mismatch (column-tiled path)"

    print("KERNEL_OK")
</pallas_src>

<mosaic_0001>
module attributes {stable_mosaic.version = 11 : i64} {
  func.func @_voting_kernel(%arg0: i32, %arg1: i32, %arg2: memref<512x640xf32, #tpu.memory_space<vmem>>, %arg3: memref<640x64xf32, #tpu.memory_space<vmem>>, %arg4: memref<512x64xf32, #tpu.memory_space<vmem>>) attributes {dimension_semantics = [#tpu.dimension_semantics<parallel>, #tpu.dimension_semantics<parallel>], iteration_bounds = array<i64: 1, 1>, scalar_prefetch = 0 : i64, scratch_operands = 0 : i64, tpu.core_type = #tpu.core_type<tc>, window_params = [{transform_indices = @transform_0, window_bounds = array<i64: 512, 640>}, {pipeline_mode = #tpu.pipeline_mode<synchronous>, transform_indices = @transform_1, window_bounds = array<i64: 640, 64>}, {transform_indices = @transform_2, window_bounds = array<i64: 512, 64>}]} {
    %c0 = arith.constant 0 : index
    %c0_0 = arith.constant 0 : index
    %0 = vector.load %arg2[%c0, %c0_0] : memref<512x640xf32, #tpu.memory_space<vmem>>, vector<512x640xf32>
    %c0_1 = arith.constant 0 : index
    %c0_2 = arith.constant 0 : index
    %1 = vector.load %arg3[%c0_1, %c0_2] : memref<640x64xf32, #tpu.memory_space<vmem>>, vector<640x64xf32>
    %cst = arith.constant dense<0.000000e+00> : vector<512x64xf32>
    %2 = tpu.matmul %0, %1, %cst {dimension_numbers = #tpu.dot_dimension_numbers<[1], [0], [0], [1], [0, 0, 1, 1], [], []>} : vector<512x640xf32>, vector<640x64xf32>, vector<512x64xf32> -> vector<512x64xf32>
    %cst_3 = arith.constant 1.000000e-01 : f32
    %3 = vector.broadcast %cst_3 : f32 to vector<512x64xf32>
    %4 = arith.mulf %2, %3 : vector<512x64xf32>
    %c0_4 = arith.constant 0 : index
    %c0_5 = arith.constant 0 : index
    %5 = vector.load %arg4[%c0_4, %c0_5] : memref<512x64xf32, #tpu.memory_space<vmem>>, vector<512x64xf32>
    tpu.vector_store %arg4[%c0_4, %c0_5], %4 {strides = array<i32>} : memref<512x64xf32, #tpu.memory_space<vmem>>, vector<512x64xf32>,
    return
  }
  func.func @transform_0(%arg0: i32, %arg1: i32) -> (i32, i32) {
    %c0_i32 = arith.constant 0 : i32
    return %arg0, %arg1 : i32, i32
  }
  func.func @transform_1(%arg0: i32, %arg1: i32) -> (i32, i32) {
    %c0_i32 = arith.constant 0 : i32
    %c0_i32_0 = arith.constant 0 : i32
    %c0_i32_1 = arith.constant 0 : i32
    return %c0_i32, %c0_i32_0 : i32, i32
  }
  func.func @transform_2(%arg0: i32, %arg1: i32) -> (i32, i32) {
    %c0_i32 = arith.constant 0 : i32
    return %arg0, %arg1 : i32, i32
  }
}

</mosaic_0001>

<bundles_post_ra>
// kernel: tpu_custom_call.1
= control target key start
LH: loop header
LB: loop body
LE: loop exit
PB: predicated region body
PF: predicated region fallthrough
CT: control target
= control target key end

     0   :  { %7 = vsyncpa [#allocation3], 0  ;;  %s2012_s9 = smov [#allocation2]   ;;  %s2977_s0 = inlined_call_operand.hbm [shape: f32[512,640], index: 0, kind: input, shape index: {}]   ;;  %s2978_s1 = inlined_call_operand.vmem [shape: f32[640,64], index: 1, kind: input, shape index: {}]   ;;  %s2979_s2 = inlined_call_operand.vmem [shape: f32[512,64], index: 2, kind: output, shape index: {}]  }
   0x1   :  { %s13_s10 = sshll.u32 %s2012_s9, 4  ;;  %s14_s10 = int_to_ptr.vmem [resolvable:$true] %s13_s10 }
   0x2   :  { %s1998_s11 = scalar_lea.vmem %s14_s10, 40960  ;;  %p2003_p1 = scmp.lt.s32.totalorder %s14_s10, %s14_s10 }
   0x3   :  { %p1999_p0 = scmp.ne.s32.totalorder %s14_s10, %s1998_s11  ;;  %p2004_p2 = scmp.lt.s32.totalorder %s1998_s11, %s1998_s11 }
   0x5   :  { %p2005_p3 = por %p2004_p2, %p2003_p1 }
   0x7   :  { %p2006_p4 = pnand %p2005_p3, %p1999_p0 }
   0x9   :  { %2009 = shalt.err (!%p2006_p4)
}
   0xa   :  { %s2013_s12 = smov 640   ;;  %s2014_s13 = smov 40  }
   0xb   :  { %19 = dma.hbm_to_vmem [thread:$0]  %s2977_s0, 40960, %s14_s10, [#allocation3], %s2013_s12, %s2013_s12, %s2014_s13  }
   0xc   :  { %2010 = dma.done.wait [#allocation3], 40960  }
   0xd   :  { %2011 = vsyncadd [#allocation3], 4294926336  ;;  %v2015_v0 = vmov 0.0   ;;  %v360_v1 = vld [vmem:[%s2978_s1 + $0x78] sm:$0xff]  ;;  %v359_v2 = vld [vmem:[%s2978_s1 + $0x70] sm:$0xff]  ;;  %vm1644_vm0 = vcmask 523264  }
   0xe   :  { %425 = vmatprep.subr.mxu0 %v2015_v0  ;;  %1922 = vmatprep.subr.mxu1 %v2015_v0  ;;  %v358_v3 = vld [vmem:[%s2978_s1 + $0x68] sm:$0xff]  ;;  %v357_v4 = vld [vmem:[%s2978_s1 + $0x60] sm:$0xff]  ;;  %v356_v5 = vld [vmem:[%s2978_s1 + $0x58] sm:$0xff] }
   0xf   :  { %426 = vmatpush1.msra.mxu0 %v360_v1  ;;  %1954 = vmatpush1.msra.mxu1 %v360_v1  ;;  %v355_v6 = vld [vmem:[%s2978_s1 + $0x50] sm:$0xff]  ;;  %v354_v7 = vld [vmem:[%s2978_s1 + $0x48] sm:$0xff]  ;;  %v353_v8 = vld [vmem:[%s2978_s1 + $0x40] sm:$0xff] }
  0x10   :  { %427 = vmatprep.subr.mxu0 %v2015_v0  ;;  %1923 = vmatprep.subr.mxu1 %v2015_v0  ;;  %v352_v9 = vld [vmem:[%s2978_s1 + $0x38] sm:$0xff]  ;;  %v351_v10 = vld [vmem:[%s2978_s1 + $0x30] sm:$0xff]  ;;  %v350_v11 = vld [vmem:[%s2978_s1 + $0x28] sm:$0xff] }
  0x11   :  { %428 = vmatpush1.msra.mxu0 %v359_v2  ;;  %1955 = vmatpush1.msra.mxu1 %v359_v2  ;;  %v349_v12 = vld [vmem:[%s2978_s1 + $0x20] sm:$0xff]  ;;  %v348_v13 = vld [vmem:[%s2978_s1 + $0x18] sm:$0xff]  ;;  %v347_v14 = vld [vmem:[%s2978_s1 + $0x10] sm:$0xff] }
  0x12   :  { %429 = vmatprep.subr.mxu0 %v2015_v0  ;;  %1924 = vmatprep.subr.mxu1 %v2015_v0  ;;  %v346_v15 = vld [vmem:[%s2978_s1 + $0x8] sm:$0xff]  ;;  %v345_v16 = vld [vmem:[%s2978_s1] sm:$0xff]  ;;  %v376_v17 = vld [vmem:[%s2978_s1 + $0xf8] sm:$0xff] }
  0x13   :  { %430 = vmatpush1.msra.mxu0 %v358_v3  ;;  %1956 = vmatpush1.msra.mxu1 %v358_v3  ;;  %v375_v18 = vld [vmem:[%s2978_s1 + $0xf0] sm:$0xff]  ;;  %v374_v19 = vld [vmem:[%s2978_s1 + $0xe8] sm:$0xff]  ;;  %v373_v20 = vld [vmem:[%s2978_s1 + $0xe0] sm:$0xff] }
  0x14   :  { %431 = vmatprep.subr.mxu0 %v2015_v0  ;;  %1925 = vmatprep.subr.mxu1 %v2015_v0  ;;  %v372_v21 = vld [vmem:[%s2978_s1 + $0xd8] sm:$0xff]  ;;  %v371_v22 = vld [vmem:[%s2978_s1 + $0xd0] sm:$0xff]  ;;  %v370_v23 = vld [vmem:[%s2978_s1 + $0xc8] sm:$0xff] }
  0x15   :  { %432 = vmatpush1.msra.mxu0 %v357_v4  ;;  %1957 = vmatpush1.msra.mxu1 %v357_v4  ;;  %v369_v24 = vld [vmem:[%s2978_s1 + $0xc0] sm:$0xff]  ;;  %v368_v25 = vld [vmem:[%s2978_s1 + $0xb8] sm:$0xff]  ;;  %v367_v26 = vld [vmem:[%s2978_s1 + $0xb0] sm:$0xff] }
  0x16   :  { %433 = vmatprep.subr.mxu0 %v2015_v0  ;;  %1926 = vmatprep.subr.mxu1 %v2015_v0  ;;  %v366_v27 = vld [vmem:[%s2978_s1 + $0xa8] sm:$0xff]  ;;  %v365_v28 = vld [vmem:[%s2978_s1 + $0xa0] sm:$0xff]  ;;  %v364_v29 = vld [vmem:[%s2978_s1 + $0x98] sm:$0xff] }
  0x17   :  { %434 = vmatpush1.msra.mxu0 %v356_v5  ;;  %1958 = vmatpush1.msra.mxu1 %v356_v5  ;;  %v363_v30 = vld [vmem:[%s2978_s1 + $0x90] sm:$0xff]  ;;  %v362_v31 = vld [vmem:[%s2978_s1 + $0x88] sm:$0xff]  ;;  %v361_v32 = vld [vmem:[%s2978_s1 + $0x80] sm:$0xff] }
  0x18   :  { %435 = vmatprep.subr.mxu0 %v2015_v0  ;;  %1927 = vmatprep.subr.mxu1 %v2015_v0  ;;  %v26_v33 = vld [vmem:[#allocation2 + $0x8] sm:$0xff]  ;;  %v25_v35 = vld [vmem:[#allocation2] sm:$0xff]  ;;  %v424_v37 = vld [vmem:[%s2978_s1 + $0x278] sm:$0xff] }
  0x19   :  { %436 = vmatpush1.msra.mxu0 %v355_v6  ;;  %1959 = vmatpush1.msra.mxu1 %v355_v6  ;;  %v266_v34 = vld [vmem:[#allocation2 + $0x788] sm:$0xff]  ;;  %v265_v36 = vld [vmem:[#allocation2 + $0x780] sm:$0xff]  ;;  %v392_v38 = vld [vmem:[%s2978_s1 + $0x178] sm:$0xff] }
  0x1a   :  { %437 = vmatprep.subr.mxu0 %v2015_v0  ;;  %1928 = vmatprep.subr.mxu1 %v2015_v0  ;;  %v31_v39 = vld [vmem:[#allocation2 + $0x30] sm:$0xff]  ;;  %v30_v42 = vld [vmem:[#allocation2 + $0x28] sm:$0xff]  ;;  %v36_v44 = vld [vmem:[#allocation2 + $0x58] sm:$0xff] }
  0x1b   :  { %438 = vmatpush1.msra.mxu0 %v354_v7  ;;  %1960 = vmatpush1.msra.mxu1 %v354_v7  ;;  %v271_v40 = vld [vmem:[#allocation2 + $0x7b0] sm:$0xff]  ;;  %v270_v43 = vld [vmem:[#allocation2 + $0x7a8] sm:$0xff]  ;;  %v276_v46 = vld [vmem:[#allocation2 + $0x7d8] sm:$0xff] }
  0x1c   :  { %439 = vmatprep.subr.mxu0 %v2015_v0  ;;  %1929 = vmatprep.subr.mxu1 %v2015_v0  ;;  %v391_v41 = vld [vmem:[%s2978_s1 + $0x170] sm:$0xff]  ;;  %v390_v45 = vld [vmem:[%s2978_s1 + $0x168] sm:$0xff]  ;;  %v389_v48 = vld [vmem:[%s2978_s1 + $0x160] sm:$0xff] }
  0x1d   :  { %440 = vmatpush1.msra.mxu0 %v353_v8  ;;  %1961 = vmatpush1.msra.mxu1 %v353_v8  ;;  %v423_v47 = vld [vmem:[%s2978_s1 + $0x270] sm:$0xff]  ;;  %v388_v51 = vld [vmem:[%s2978_s1 + $0x158] sm:$0xff]  ;;  %v41_v52 = vld [vmem:[#allocation2 + $0x80] sm:$0xff] }
  0x1e   :  { %441 = vmatprep.subr.mxu0 %v2015_v0  ;;  %1930 = vmatprep.subr.mxu1 %v2015_v0  ;;  %v35_v49 = vld [vmem:[#allocation2 + $0x50] sm:$0xff]  ;;  %v281_v53 = vld [vmem:[#allocation2 + $0x800] sm:$0xff]  ;;  %v40_v55 = vld [vmem:[#allocation2 + $0x78] sm:$0xff] }
  0x1f   :  { %442 = vmatpush1.msra.mxu0 %v352_v9  ;;  %1962 = vmatpush1.msra.mxu1 %v352_v9  ;;  %v275_v50 = vld [vmem:[#allocation2 + $0x7d0] sm:$0xff]  ;;  %v280_v56 = vld [vmem:[#allocation2 + $0x7f8] sm:$0xff]  ;;  %v386_v57 = vld [vmem:[%s2978_s1 + $0x148] sm:$0xff] }
  0x20   :  { %443 = vmatprep.subr.mxu0 %v2015_v0  ;;  %1931 = vmatprep.subr.mxu1 %v2015_v0  ;;  %v387_v54 = vld [vmem:[%s2978_s1 + $0x150] sm:$0xff]  ;;  %v46_v58 = vld [vmem:[#allocation2 + $0xa8] sm:$0xff]  ;;  %v385_v60 = vld [vmem:[%s2978_s1 + $0x140] sm:$0xff] }
  0x21   :  { %444 = vmatpush1.msra.mxu0 %v351_v10  ;;  %1963 = vmatpush1.msra.mxu1 %v351_v10  ;;  %v286_v59 = vld [vmem:[#allocation2 + $0x828] sm:$0xff]  ;;  %v45_v61 = vld [vmem:[#allocation2 + $0xa0] sm:$0xff]  ;;  %v51_v63 = vld [vmem:[#allocation2 + $0xd0] sm:$0xff] }
  0x22   :  { %445 = vmatprep.subr.mxu0 %v2015_v0  ;;  %1932 = vmatprep.subr.mxu1 %v2015_v0  ;;  %v285_v62 = vld [vmem:[#allocation2 + $0x820] sm:$0xff]  ;;  %v384_v1 = vld [vmem:[%s2978_s1 + $0x138] sm:$0xff]  ;;  %v291_v2 = vld [vmem:[#allocation2 + $0x850] sm:$0xff] }
  0x23   :  { %446 = vmatpush1.msra.mxu0 %v350_v11  ;;  %1964 = vmatpush1.msra.mxu1 %v350_v11  ;;  %v422_v3 = vld [vmem:[%s2978_s1 + $0x268] sm:$0xff]  ;;  %v383_v4 = vld [vmem:[%s2978_s1 + $0x130] sm:$0xff]  ;;  %v56_v8 = vld [vmem:[#allocation2 + $0xf8] sm:$0xff] }
  0x24   :  { %447 = vmatprep.subr.mxu0 %v2015_v0  ;;  %1933 = vmatprep.subr.mxu1 %v2015_v0  ;;  %v50_v5 = vld [vmem:[#allocation2 + $0xc8] sm:$0xff]  ;;  %v296_v9 = vld [vmem:[#allocation2 + $0x878] sm:$0xff]  ;;  %v381_v10 = vld [vmem:[%s2978_s1 + $0x120] sm:$0xff] }
  0x25   :  { %448 = vmatpush1.msra.mxu0 %v349_v12  ;;  %1965 = vmatpush1.msra.mxu1 %v349_v12  ;;  %v290_v6 = vld [vmem:[#allocation2 + $0x848] sm:$0xff]  ;;  %v55_v11 = vld [vmem:[#allocation2 + $0xf0] sm:$0xff] }
  0x26   :  { %449 = vmatprep.subr.mxu0 %v2015_v0  ;;  %1934 = vmatprep.subr.mxu1 %v2015_v0  ;;  %v382_v7 = vld [vmem:[%s2978_s1 + $0x128] sm:$0xff]  ;;  %v295_v12 = vld [vmem:[#allocation2 + $0x870] sm:$0xff] }
  0x27   :  { %450 = vmatpush1.msra.mxu0 %v348_v13  ;;  %1966 = vmatpush1.msra.mxu1 %v348_v13  ;;  %v380_v13 = vld [vmem:[%s2978_s1 + $0x118] sm:$0xff] }
  0x28   :  { %451 = vmatprep.subr.mxu0 %v2015_v0  ;;  %1935 = vmatprep.subr.mxu1 %v2015_v0 }
  0x29   :  { %452 = vmatpush1.msra.mxu0 %v347_v14  ;;  %1967 = vmatpush1.msra.mxu1 %v347_v14  ;;  %v61_v14 = vld [vmem:[#allocation2 + $0x120] sm:$0xff] }
  0x2a   :  { %453 = vmatprep.subr.mxu0 %v2015_v0  ;;  %1936 = vmatprep.subr.mxu1 %v2015_v0 }
  0x2b   :  { %454 = vmatpush1.msra.mxu0 %v346_v15  ;;  %1968 = vmatpush1.msra.mxu1 %v346_v15  ;;  %v301_v15 = vld [vmem:[#allocation2 + $0x8a0] sm:$0xff] }
  0x2c   :  { %455 = vmatprep.subr.mxu0 %v2015_v0  ;;  %1937 = vmatprep.subr.mxu1 %v2015_v0 }
  0x2d   :  { %456 = vmatpush1.msra.mxu0 %v345_v16  ;;  %1969 = vmatpush1.msra.mxu1 %v345_v16  ;;  %v379_v16 = vld [vmem:[%s2978_s1 + $0x110] sm:$0xff] }
  0x2e   :  { %457 = vmatprep.subr.mxu0 %v2015_v0  ;;  %1938 = vmatprep.subr.mxu1 %v2015_v0 }
  0x2f   :  { %458 = vmatpush2.msra.mxu0 %v376_v17  ;;  %1970 = vmatpush2.msra.mxu1 %v376_v17  ;;  %v60_v17 = vld [vmem:[#allocation2 + $0x118] sm:$0xff] }
  0x30   :  { %459 = vmatprep.subr.mxu0 %v2015_v0  ;;  %1939 = vmatprep.subr.mxu1 %v2015_v0 }
  0x31   :  { %460 = vmatpush2.msra.mxu0 %v375_v18  ;;  %1971 = vmatpush2.msra.mxu1 %v375_v18  ;;  %v300_v18 = vld [vmem:[#allocation2 + $0x898] sm:$0xff] }
  0x32   :  { %461 = vmatprep.subr.mxu0 %v2015_v0  ;;  %1940 = vmatprep.subr.mxu1 %v2015_v0 }
  0x33   :  { %462 = vmatpush2.msra.mxu0 %v374_v19  ;;  %1972 = vmatpush2.msra.mxu1 %v374_v19  ;;  %v66_v19 = vld [vmem:[#allocation2 + $0x148] sm:$0xff] }
  0x34   :  { %463 = vmatprep.subr.mxu0 %v2015_v0  ;;  %1941 = vmatprep.subr.mxu1 %v2015_v0 }
  0x35   :  { %464 = vmatpush2.msra.mxu0 %v373_v20  ;;  %1973 = vmatpush2.msra.mxu1 %v373_v20  ;;  %v378_v20 = vld [vmem:[%s2978_s1 + $0x108] sm:$0xff] }
  0x36   :  { %465 = vmatprep.subr.mxu0 %v2015_v0  ;;  %1942 = vmatprep.subr.mxu1 %v2015_v0 }
  0x37   :  { %466 = vmatpush2.msra.mxu0 %v372_v21  ;;  %1974 = vmatpush2.msra.mxu1 %v372_v21  ;;  %v306_v21 = vld [vmem:[#allocation2 + $0x8c8] sm:$0xff] }
  0x38   :  { %467 = vmatprep.subr.mxu0 %v2015_v0  ;;  %1943 = vmatprep.subr.mxu1 %v2015_v0 }
  0x39   :  { %468 = vmatpush2.msra.mxu0 %v371_v22  ;;  %1975 = vmatpush2.msra.mxu1 %v371_v22  ;;  %v421_v22 = vld [vmem:[%s2978_s1 + $0x260] sm:$0xff] }
  0x3a   :  { %469 = vmatprep.subr.mxu0 %v2015_v0  ;;  %1944 = vmatprep.subr.mxu1 %v2015_v0 }
  0x3b   :  { %470 = vmatpush2.msra.mxu0 %v370_v23  ;;  %1976 = vmatpush2.msra.mxu1 %v370_v23  ;;  %v377_v23 = vld [vmem:[%s2978_s1 + $0x100] sm:$0xff] }
  0x3c   :  { %471 = vmatprep.subr.mxu0 %v2015_v0  ;;  %1945 = vmatprep.subr.mxu1 %v2015_v0 }
  0x3d   :  { %472 = vmatpush2.msra.mxu0 %v369_v24  ;;  %1977 = vmatpush2.msra.mxu1 %v369_v24  ;;  %v65_v24 = vld [vmem:[#allocation2 + $0x140] sm:$0xff] }
  0x3e   :  { %473 = vmatprep.subr.mxu0 %v2015_v0  ;;  %1946 = vmatprep.subr.mxu1 %v2015_v0 }
  0x3f   :  { %474 = vmatpush2.msra.mxu0 %v368_v25  ;;  %1978 = vmatpush2.msra.mxu1 %v368_v25  ;;  %v305_v25 = vld [vmem:[#allocation2 + $0x8c0] sm:$0xff] }
  0x40   :  { %475 = vmatprep.subr.mxu0 %v2015_v0  ;;  %1947 = vmatprep.subr.mxu1 %v2015_v0 }
  0x41   :  { %476 = vmatpush2.msra.mxu0 %v367_v26  ;;  %1979 = vmatpush2.msra.mxu1 %v367_v26  ;;  %v408_v26 = vld [vmem:[%s2978_s1 + $0x1f8] sm:$0xff] }
  0x42   :  { %477 = vmatprep.subr.mxu0 %v2015_v0  ;;  %1948 = vmatprep.subr.mxu1 %v2015_v0 }
  0x43   :  { %478 = vmatpush2.msra.mxu0 %v366_v27  ;;  %1980 = vmatpush2.msra.mxu1 %v366_v27  ;;  %v71_v27 = vld [vmem:[#allocation2 + $0x170] sm:$0xff] }
  0x44   :  { %479 = vmatprep.subr.mxu0 %v2015_v0  ;;  %1949 = vmatprep.subr.mxu1 %v2015_v0 }
  0x45   :  { %480 = vmatpush2.msra.mxu0 %v365_v28  ;;  %1981 = vmatpush2.msra.mxu1 %v365_v28  ;;  %v311_v28 = vld [vmem:[#allocation2 + $0x8f0] sm:$0xff] }
  0x46   :  { %481 = vmatprep.subr.mxu0 %v2015_v0  ;;  %1950 = vmatprep.subr.mxu1 %v2015_v0 }
  0x47   :  { %482 = vmatpush2.msra.mxu0 %v364_v29  ;;  %1982 = vmatpush2.msra.mxu1 %v364_v29  ;;  %v407_v29 = vld [vmem:[%s2978_s1 + $0x1f0] sm:$0xff] }
  0x48   :  { %483 = vmatprep.subr.mxu0 %v2015_v0  ;;  %1951 = vmatprep.subr.mxu1 %v2015_v0 }
  0x49   :  { %484 = vmatpush2.msra.mxu0 %v363_v30  ;;  %1983 = vmatpush2.msra.mxu1 %v363_v30  ;;  %v70_v30 = vld [vmem:[#allocation2 + $0x168] sm:$0xff] }
  0x4a   :  { %485 = vmatprep.subr.mxu0 %v2015_v0  ;;  %1952 = vmatprep.subr.mxu1 %v2015_v0 }
  0x4b   :  { %486 = vmatpush2.msra.mxu0 %v362_v31  ;;  %1984 = vmatpush2.msra.mxu1 %v362_v31  ;;  %v310_v31 = vld [vmem:[#allocation2 + $0x8e8] sm:$0xff] }
  0x4c   :  { %487 = vmatprep.subr.mxu0 %v2015_v0  ;;  %1953 = vmatprep.subr.mxu1 %v2015_v0 }
  0x4d   :  { %488 = vmatpush2.msra.mxu0 %v361_v32  ;;  %1985 = vmatpush2.msra.mxu1 %v361_v32  ;;  %v406_v32 = vld [vmem:[%s2978_s1 + $0x1e8] sm:$0xff] }
  0x4e   :  { %489 = vmatprep.mubr.f32.mxu0 %v26_v33  ;;  %729 = vmatprep.mubr.f32.mxu1 %v266_v34  ;;  %v76_v33 = vld [vmem:[#allocation2 + $0x198] sm:$0xff] }
  0x4f   :  { %490 = vmatmul.mubr.f32.vlgmr.msra.gmra.mxu0 %v25_v35  ;;  %730 = vmatmul.mubr.f32.vlgmr.msra.gmra.mxu1 %v265_v36  ;;  %v316_v34 = vld [vmem:[#allocation2 + $0x918] sm:$0xff]  ;;  %v405_v35 = vld [vmem:[%s2978_s1 + $0x1e0] sm:$0xff]  ;;  %v75_v36 = vld [vmem:[#allocation2 + $0x190] sm:$0xff] }
  0x50   :  { %810 = vmatprep.subr.mxu1 %v2015_v0  ;;  %1794 = vmatprep.subr.mxu0 %v424_v37 }
  0x51   :  { %811 = vmatpush1.msra.mxu1 %v392_v38  ;;  %1795 = vmatpush3.msra.mxu0 %v424_v37  ;;  %v315_v37 = vld [vmem:[#allocation2 + $0x910] sm:$0xff]  ;;  %v81_v38 = vld [vmem:[#allocation2 + $0x1c0] sm:$0xff] }
  0x52   :  { %812 = vmatprep.subr.mxu1 %v2015_v0  ;;  %494 = vmatprep.mubr.f32.mxu0 %v31_v39  ;;  %v404_v39 = vld [vmem:[%s2978_s1 + $0x1d8] sm:$0xff] }
  0x53   :  { %734 = vmatprep.mubr.f32.mxu1 %v271_v40  ;;  %813 = vmatpush1.msra.mxu1 %v391_v41  ;;  %v321_v40 = vld [vmem:[#allocation2 + $0x940] sm:$0xff]  ;;  %v420_v41 = vld [vmem:[%s2978_s1 + $0x258] sm:$0xff] }
  0x54   :  { %495 = vmatmul.mubr.f32.gmra.mxu0 %v30_v42  ;;  %735 = vmatmul.mubr.f32.gmra.mxu1 %v270_v43  ;;  %v403_v42 = vld [vmem:[%s2978_s1 + $0x1d0] sm:$0xff]  ;;  %v80_v43 = vld [vmem:[#allocation2 + $0x1b8] sm:$0xff] }
  0x55   :  { %814 = vmatprep.subr.mxu1 %v2015_v0  ;;  %499 = vmatprep.mubr.f32.mxu0 %v36_v44  ;;  %v320_v44 = vld [vmem:[#allocation2 + $0x938] sm:$0xff] }
  0x56   :  { %815 = vmatpush1.msra.mxu1 %v390_v45  ;;  %739 = vmatprep.mubr.f32.mxu1 %v276_v46  ;;  %v402_v45 = vld [vmem:[%s2978_s1 + $0x1c8] sm:$0xff] }
  0x57   :  { %816 = vmatprep.subr.mxu1 %v2015_v0  ;;  %1796 = vmatprep.subr.mxu0 %v423_v47  ;;  %v86_v46 = vld [vmem:[#allocation2 + $0x1e8] sm:$0xff] }
  0x58   :  { %817 = vmatpush1.msra.mxu1 %v389_v48  ;;  %500 = vmatmul.mubr.f32.gmra.mxu0 %v35_v49  ;;  %v401_v48 = vld [vmem:[%s2978_s1 + $0x1c0] sm:$0xff] }
  0x59   :  { %740 = vmatmul.mubr.f32.gmra.mxu1 %v275_v50  ;;  %818 = vmatprep.subr.mxu1 %v2015_v0  ;;  %v85_v49 = vld [vmem:[#allocation2 + $0x1e0] sm:$0xff] }
  0x5a   :  { %819 = vmatpush1.msra.mxu1 %v388_v51  ;;  %504 = vmatprep.mubr.f32.mxu0 %v41_v52  ;;  %v325_v50 = vld [vmem:[#allocation2 + $0x960] sm:$0xff]  ;;  %v400_v51 = vld [vmem:[%s2978_s1 + $0x1b8] sm:$0xff]  ;;  %v91_v52 = vld [vmem:[#allocation2 + $0x210] sm:$0xff] }
  0x5b   :  { %820 = vmatprep.subr.mxu1 %v2015_v0  ;;  %744 = vmatprep.mubr.f32.mxu1 %v281_v53  ;;  %v331_v53 = vld [vmem:[#allocation2 + $0x990] sm:$0xff] }
  0x5c   :  { %821 = vmatpush1.msra.mxu1 %v387_v54  ;;  %505 = vmatmul.mubr.f32.gmra.mxu0 %v40_v55  ;;  %v399_v54 = vld [vmem:[%s2978_s1 + $0x1b0] sm:$0xff]  ;;  %v90_v55 = vld [vmem:[#allocation2 + $0x208] sm:$0xff] }
  0x5d   :  { %745 = vmatmul.mubr.f32.gmra.mxu1 %v280_v56  ;;  %822 = vmatprep.subr.mxu1 %v2015_v0  ;;  %v330_v56 = vld [vmem:[#allocation2 + $0x988] sm:$0xff] }
  0x5e   :  { %823 = vmatpush1.msra.mxu1 %v386_v57  ;;  %1797 = vmatpush3.msra.mxu0 %v423_v47  ;;  %v326_v47 = vld [vmem:[#allocation2 + $0x968] sm:$0xff]  ;;  %v96_v57 = vld [vmem:[#allocation2 + $0x238] sm:$0xff] }
  0x5f   :  { %824 = vmatprep.subr.mxu1 %v2015_v0  ;;  %509 = vmatprep.mubr.f32.mxu0 %v46_v58  ;;  %v398_v58 = vld [vmem:[%s2978_s1 + $0x1a8] sm:$0xff] }
  0x60   :  { %749 = vmatprep.mubr.f32.mxu1 %v286_v59  ;;  %825 = vmatpush1.msra.mxu1 %v385_v60  ;;  %v336_v59 = vld [vmem:[#allocation2 + $0x9b8] sm:$0xff]  ;;  %v419_v60 = vld [vmem:[%s2978_s1 + $0x250] sm:$0xff] }
  0x61   :  { %510 = vmatmul.mubr.f32.gmra.mxu0 %v45_v61  ;;  %750 = vmatmul.mubr.f32.gmra.mxu1 %v285_v62  ;;  %v397_v61 = vld [vmem:[%s2978_s1 + $0x1a0] sm:$0xff]  ;;  %v95_v62 = vld [vmem:[#allocation2 + $0x230] sm:$0xff] }
  0x62   :  { %826 = vmatprep.subr.mxu1 %v2015_v0  ;;  %514 = vmatprep.mubr.f32.mxu0 %v51_v63  ;;  %v335_v63 = vld [vmem:[#allocation2 + $0x9b0] sm:$0xff] }
  0x63   :  { %827 = vmatpush1.msra.mxu1 %v384_v1  ;;  %754 = vmatprep.mubr.f32.mxu1 %v291_v2  ;;  %v396_v1 = vld [vmem:[%s2978_s1 + $0x198] sm:$0xff]  ;;  %v101_v2 = vld [vmem:[#allocation2 + $0x260] sm:$0xff] }
  0x64   :  { %828 = vmatprep.subr.mxu1 %v2015_v0  ;;  %1798 = vmatprep.subr.mxu0 %v422_v3 }
  0x65   :  { %829 = vmatpush1.msra.mxu1 %v383_v4  ;;  %515 = vmatmul.mubr.f32.gmra.mxu0 %v50_v5  ;;  %v395_v4 = vld [vmem:[%s2978_s1 + $0x190] sm:$0xff]  ;;  %v100_v5 = vld [vmem:[#allocation2 + $0x258] sm:$0xff] }
  0x66   :  { %755 = vmatmul.mubr.f32.gmra.mxu1 %v290_v6  ;;  %830 = vmatprep.subr.mxu1 %v2015_v0  ;;  %v340_v6 = vld [vmem:[#allocation2 + $0x9d8] sm:$0xff] }
  0x67   :  { %831 = vmatpush1.msra.mxu1 %v382_v7  ;;  %519 = vmatprep.mubr.f32.mxu0 %v56_v8  ;;  %v394_v7 = vld [vmem:[%s2978_s1 + $0x188] sm:$0xff] }
  0x68   :  { %832 = vmatprep.subr.mxu1 %v2015_v0  ;;  %759 = vmatprep.mubr.f32.mxu1 %v296_v9  ;;  %v106_v8 = vld [vmem:[#allocation2 + $0x288] sm:$0xff]  ;;  %v393_v9 = vld [vmem:[%s2978_s1 + $0x180] sm:$0xff] }
  0x69   :  { %833 = vmatpush1.msra.mxu1 %v381_v10  ;;  %520 = vmatmul.mubr.f32.gmra.mxu0 %v55_v11  ;;  %v28_v10 = vld [vmem:[#allocation2 + $0x18] sm:$0xff]  ;;  %v105_v11 = vld [vmem:[#allocation2 + $0x280] sm:$0xff] }
  0x6a   :  { %760 = vmatmul.mubr.f32.gmra.mxu1 %v295_v12  ;;  %834 = vmatprep.subr.mxu1 %v2015_v0  ;;  %v27_v12 = vld [vmem:[#allocation2 + $0x10] sm:$0xff] }
  0x6b   :  { %835 = vmatpush1.msra.mxu1 %v380_v13  ;;  %1799 = vmatpush3.msra.mxu0 %v422_v3  ;;  %v341_v3 = vld [vmem:[#allocation2 + $0x9e0] sm:$0xff]  ;;  %v111_v13 = vld [vmem:[#allocation2 + $0x2b0] sm:$0xff] }
  0x6c   :  { %836 = vmatprep.subr.mxu1 %v2015_v0  ;;  %524 = vmatprep.mubr.f32.mxu0 %v61_v14  ;;  %v33_v14 = vld [vmem:[#allocation2 + $0x40] sm:$0xff] }
  0x6d   :  { %764 = vmatprep.mubr.f32.mxu1 %v301_v15  ;;  %837 = vmatpush1.msra.mxu1 %v379_v16  ;;  %v418_v15 = vld [vmem:[%s2978_s1 + $0x248] sm:$0xff] }
  0x6e   :  { %525 = vmatmul.mubr.f32.gmra.mxu0 %v60_v17  ;;  %765 = vmatmul.mubr.f32.gmra.mxu1 %v300_v18  ;;  %v110_v16 = vld [vmem:[#allocation2 + $0x2a8] sm:$0xff]  ;;  %v32_v17 = vld [vmem:[#allocation2 + $0x38] sm:$0xff] }
  0x6f   :  { %838 = vmatprep.subr.mxu1 %v2015_v0  ;;  %529 = vmatprep.mubr.f32.mxu0 %v66_v19  ;;  %v116_v18 = vld [vmem:[#allocation2 + $0x2d8] sm:$0xff]  ;;  %v38_v19 = vld [vmem:[#allocation2 + $0x68] sm:$0xff] }
  0x70   :  { %839 = vmatpush1.msra.mxu1 %v378_v20  ;;  %769 = vmatprep.mubr.f32.mxu1 %v306_v21  ;;  %v115_v20 = vld [vmem:[#allocation2 + $0x2d0] sm:$0xff]  ;;  %v37_v21 = vld [vmem:[#allocation2 + $0x60] sm:$0xff] }
  0x71   :  { %840 = vmatprep.subr.mxu1 %v2015_v0  ;;  %1800 = vmatprep.subr.mxu0 %v421_v22 }
  0x72   :  { %841 = vmatpush1.msra.mxu1 %v377_v23  ;;  %530 = vmatmul.mubr.f32.gmra.mxu0 %v65_v24  ;;  %v43_v23 = vld [vmem:[#allocation2 + $0x90] sm:$0xff]  ;;  %v416_v24 = vld [vmem:[%s2978_s1 + $0x238] sm:$0xff] }
  0x73   :  { %770 = vmatmul.mubr.f32.gmra.mxu1 %v305_v25  ;;  %842 = vmatprep.subr.mxu1 %v2015_v0  ;;  %v120_v25 = vld [vmem:[#allocation2 + $0x2f8] sm:$0xff] }
  0x74   :  { %843 = vmatpush2.msra.mxu1 %v408_v26  ;;  %534 = vmatprep.mubr.f32.mxu0 %v71_v27  ;;  %v42_v26 = vld [vmem:[#allocation2 + $0x88] sm:$0xff] }
  0x75   :  { %844 = vmatprep.subr.mxu1 %v2015_v0  ;;  %774 = vmatprep.mubr.f32.mxu1 %v311_v28  ;;  %v126_v27 = vld [vmem:[#allocation2 + $0x328] sm:$0xff]  ;;  %v48_v28 = vld [vmem:[#allocation2 + $0xb8] sm:$0xff] }
  0x76   :  { %845 = vmatpush2.msra.mxu1 %v407_v29  ;;  %535 = vmatmul.mubr.f32.gmra.mxu0 %v70_v30  ;;  %v415_v29 = vld [vmem:[%s2978_s1 + $0x230] sm:$0xff]  ;;  %v125_v30 = vld [vmem:[#allocation2 + $0x320] sm:$0xff] }
  0x77   :  { %775 = vmatmul.mubr.f32.gmra.mxu1 %v310_v31  ;;  %846 = vmatprep.subr.mxu1 %v2015_v0  ;;  %v47_v31 = vld [vmem:[#allocation2 + $0xb0] sm:$0xff] }
  0x78   :  { %847 = vmatpush2.msra.mxu1 %v406_v32  ;;  %1801 = vmatpush3.msra.mxu0 %v421_v22  ;;  %v121_v22 = vld [vmem:[#allocation2 + $0x300] sm:$0xff]  ;;  %v131_v32 = vld [vmem:[#allocation2 + $0x350] sm:$0xff] }
  0x79   :  { %848 = vmatprep.subr.mxu1 %v2015_v0  ;;  %539 = vmatprep.mubr.f32.mxu0 %v76_v33  ;;  %v53_v33 = vld [vmem:[#allocation2 + $0xe0] sm:$0xff] }
  0x7a   :  { %779 = vmatprep.mubr.f32.mxu1 %v316_v34  ;;  %849 = vmatpush2.msra.mxu1 %v405_v35  ;;  %v414_v34 = vld [vmem:[%s2978_s1 + $0x228] sm:$0xff] }
  0x7b   :  { %540 = vmatmul.mubr.f32.gmra.mxu0 %v75_v36  ;;  %780 = vmatmul.mubr.f32.gmra.mxu1 %v315_v37  ;;  %v130_v35 = vld [vmem:[#allocation2 + $0x348] sm:$0xff]  ;;  %v52_v36 = vld [vmem:[#allocation2 + $0xd8] sm:$0xff] }
  0x7c   :  { %850 = vmatprep.subr.mxu1 %v2015_v0  ;;  %544 = vmatprep.mubr.f32.mxu0 %v81_v38  ;;  %v136_v37 = vld [vmem:[#allocation2 + $0x378] sm:$0xff]  ;;  %v58_v38 = vld [vmem:[#allocation2 + $0x108] sm:$0xff] }
  0x7d   :  { %851 = vmatpush2.msra.mxu1 %v404_v39  ;;  %784 = vmatprep.mubr.f32.mxu1 %v321_v40  ;;  %v413_v39 = vld [vmem:[%s2978_s1 + $0x220] sm:$0xff]  ;;  %v135_v40 = vld [vmem:[#allocation2 + $0x370] sm:$0xff] }
  0x7e   :  { %852 = vmatprep.subr.mxu1 %v2015_v0  ;;  %1802 = vmatprep.subr.mxu0 %v420_v41 }
  0x7f   :  { %853 = vmatpush2.msra.mxu1 %v403_v42  ;;  %545 = vmatmul.mubr.f32.gmra.mxu0 %v80_v43  ;;  %v141_v42 = vld [vmem:[#allocation2 + $0x3a0] sm:$0xff]  ;;  %v63_v43 = vld [vmem:[#allocation2 + $0x130] sm:$0xff] }
  0x80   :  { %785 = vmatmul.mubr.f32.gmra.mxu1 %v320_v44  ;;  %854 = vmatprep.subr.mxu1 %v2015_v0  ;;  %v412_v44 = vld [vmem:[%s2978_s1 + $0x218] sm:$0xff] }
  0x81   :  { %855 = vmatpush2.msra.mxu1 %v402_v45  ;;  %549 = vmatprep.mubr.f32.mxu0 %v86_v46  ;;  %v140_v45 = vld [vmem:[#allocation2 + $0x398] sm:$0xff]  ;;  %v62_v46 = vld [vmem:[#allocation2 + $0x128] sm:$0xff] }
  0x82   :  { %856 = vmatprep.subr.mxu1 %v2015_v0  ;;  %789 = vmatprep.mubr.f32.mxu1 %v326_v47  ;;  %v146_v47 = vld [vmem:[#allocation2 + $0x3c8] sm:$0xff] }
  0x83   :  { %857 = vmatpush2.msra.mxu1 %v401_v48  ;;  %550 = vmatmul.mubr.f32.gmra.mxu0 %v85_v49  ;;  %v68_v48 = vld [vmem:[#allocation2 + $0x158] sm:$0xff]  ;;  %v411_v49 = vld [vmem:[%s2978_s1 + $0x210] sm:$0xff] }
  0x84   :  { %790 = vmatmul.mubr.f32.gmra.mxu1 %v325_v50  ;;  %858 = vmatprep.subr.mxu1 %v2015_v0  ;;  %v145_v50 = vld [vmem:[#allocation2 + $0x3c0] sm:$0xff] }
  0x85   :  { %859 = vmatpush2.msra.mxu1 %v400_v51  ;;  %1803 = vmatpush3.msra.mxu0 %v420_v41  ;;  %v57_v41 = vld [vmem:[#allocation2 + $0x100] sm:$0xff]  ;;  %v67_v51 = vld [vmem:[#allocation2 + $0x150] sm:$0xff] }
  0x86   :  { %860 = vmatprep.subr.mxu1 %v2015_v0  ;;  %554 = vmatprep.mubr.f32.mxu0 %v91_v52  ;;  %v151_v52 = vld [vmem:[#allocation2 + $0x3f0] sm:$0xff] }
  0x87   :  { %794 = vmatprep.mubr.f32.mxu1 %v331_v53  ;;  %861 = vmatpush2.msra.mxu1 %v399_v54  ;;  %v73_v53 = vld [vmem:[#allocation2 + $0x180] sm:$0xff]  ;;  %v410_v54 = vld [vmem:[%s2978_s1 + $0x208] sm:$0xff] }
  0x88   :  { %555 = vmatmul.mubr.f32.gmra.mxu0 %v90_v55  ;;  %795 = vmatmul.mubr.f32.gmra.mxu1 %v330_v56  ;;  %v150_v55 = vld [vmem:[#allocation2 + $0x3e8] sm:$0xff]  ;;  %v72_v56 = vld [vmem:[#allocation2 + $0x178] sm:$0xff] }
  0x89   :  { %862 = vmatprep.subr.mxu1 %v2015_v0  ;;  %559 = vmatprep.mubr.f32.mxu0 %v96_v57  ;;  %v156_v57 = vld [vmem:[#allocation2 + $0x418] sm:$0xff] }
  0x8a   :  { %863 = vmatpush2.msra.mxu1 %v398_v58  ;;  %799 = vmatprep.mubr.f32.mxu1 %v336_v59  ;;  %v78_v58 = vld [vmem:[#allocation2 + $0x1a8] sm:$0xff]  ;;  %v409_v59 = vld [vmem:[%s2978_s1 + $0x200] sm:$0xff] }
  0x8b   :  { %864 = vmatprep.subr.mxu1 %v2015_v0  ;;  %1804 = vmatprep.subr.mxu0 %v419_v60 }
  0x8c   :  { %865 = vmatpush2.msra.mxu1 %v397_v61  ;;  %560 = vmatmul.mubr.f32.gmra.mxu0 %v95_v62  ;;  %v77_v61 = vld [vmem:[#allocation2 + $0x1a0] sm:$0xff] }
  0x8d   :  { %800 = vmatmul.mubr.f32.gmra.mxu1 %v335_v63  ;;  %866 = vmatprep.subr.mxu1 %v2015_v0  ;;  %v161_v62 = vld [vmem:[#allocation2 + $0x440] sm:$0xff]  ;;  %v83_v63 = vld [vmem:[#allocation2 + $0x1d0] sm:$0xff] }
  0x8e   :  { %867 = vmatpush2.msra.mxu1 %v396_v1  ;;  %564 = vmatprep.mubr.f32.mxu0 %v101_v2  ;;  %v160_v1 = vld [vmem:[#allocation2 + $0x438] sm:$0xff]  ;;  %v82_v2 = vld [vmem:[#allocation2 + $0x1c8] sm:$0xff] }
  0x8f   :  { %868 = vmatprep.subr.mxu1 %v2015_v0  ;;  %804 = vmatprep.mubr.f32.mxu1 %v341_v3  ;;  %v166_v3 = vld [vmem:[#allocation2 + $0x468] sm:$0xff] }
  0x90   :  { %869 = vmatpush2.msra.mxu1 %v395_v4  ;;  %565 = vmatmul.mubr.f32.gmra.mxu0 %v100_v5  ;;  %v88_v4 = vld [vmem:[#allocation2 + $0x1f8] sm:$0xff]  ;;  %v165_v5 = vld [vmem:[#allocation2 + $0x460] sm:$0xff] }
  0x91   :  { %805 = vmatmul.mubr.f32.gmra.mxu1 %v340_v6  ;;  %870 = vmatprep.subr.mxu1 %v2015_v0  ;;  %v87_v6 = vld [vmem:[#allocation2 + $0x1f0] sm:$0xff] }
  0x92   :  { %871 = vmatpush2.msra.mxu1 %v394_v7  ;;  %1805 = vmatpush3.msra.mxu0 %v419_v60  ;;  %v155_v60 = vld [vmem:[#allocation2 + $0x410] sm:$0xff] }
  0x93   :  { %872 = vmatprep.subr.mxu1 %v2015_v0  ;;  %569 = vmatprep.mubr.f32.mxu0 %v106_v8  ;;  %v417_v0 = vld [vmem:[%s2978_s1 + $0x240] sm:$0xff]  ;;  %v171_v7 = vld [vmem:[#allocation2 + $0x490] sm:$0xff] }
  0x94   :  { %873 = vmatpush2.msra.mxu1 %v393_v9  ;;  %874 = vmatprep.mubr.f32.mxu1 %v28_v10  ;;  %v93_v8 = vld [vmem:[#allocation2 + $0x220] sm:$0xff]  ;;  %v170_v9 = vld [vmem:[#allocation2 + $0x488] sm:$0xff]  ;;  %v92_v10 = vld [vmem:[#allocation2 + $0x218] sm:$0xff] }
  0x95   :  { %570 = vmatmul.mubr.f32.gmra.mxu0 %v105_v11  ;;  %875 = vmatmul.mubr.f32.vlgmr.msra.gmra.mxu1 %v27_v12  ;;  %v176_v11 = vld [vmem:[#allocation2 + $0x4b8] sm:$0xff]  ;;  %v98_v12 = vld [vmem:[#allocation2 + $0x248] sm:$0xff] }
  0x96   :  { %574 = vmatprep.mubr.f32.mxu0 %v111_v13  ;;  %879 = vmatprep.mubr.f32.mxu1 %v33_v14  ;;  %v175_v13 = vld [vmem:[#allocation2 + $0x4b0] sm:$0xff]  ;;  %v97_v14 = vld [vmem:[#allocation2 + $0x240] sm:$0xff] }
  0x97   :  { %1806 = vmatprep.subr.mxu0 %v418_v15 }
  0x98   :  { %1807 = vmatpush3.msra.mxu0 %v418_v15  ;;  %v181_v15 = vld [vmem:[#allocation2 + $0x4e0] sm:$0xff] }
  0x99   :  { %575 = vmatmul.mubr.f32.gmra.mxu0 %v110_v16  ;;  %880 = vmatmul.mubr.f32.gmra.mxu1 %v32_v17  ;;  %v103_v16 = vld [vmem:[#allocation2 + $0x270] sm:$0xff]  ;;  %v180_v17 = vld [vmem:[#allocation2 + $0x4d8] sm:$0xff] }
  0x9a   :  { %579 = vmatprep.mubr.f32.mxu0 %v116_v18  ;;  %884 = vmatprep.mubr.f32.mxu1 %v38_v19  ;;  %v102_v18 = vld [vmem:[#allocation2 + $0x268] sm:$0xff] }
  0x9b   :  { %1808 = vmatprep.subr.mxu0 %v417_v0  ;;  %v186_v19 = vld [vmem:[#allocation2 + $0x508] sm:$0xff] }
  0x9c   :  { %1809 = vmatpush3.msra.mxu0 %v417_v0  ;;  %v108_v0 = vld [vmem:[#allocation2 + $0x298] sm:$0xff] }
  0x9d   :  { %580 = vmatmul.mubr.f32.gmra.mxu0 %v115_v20  ;;  %885 = vmatmul.mubr.f32.gmra.mxu1 %v37_v21  ;;  %v185_v20 = vld [vmem:[#allocation2 + $0x500] sm:$0xff]  ;;  %v107_v21 = vld [vmem:[#allocation2 + $0x290] sm:$0xff] }
  0x9e   :  { %584 = vmatprep.mubr.f32.mxu0 %v121_v22  ;;  %889 = vmatprep.mubr.f32.mxu1 %v43_v23  ;;  %v191_v22 = vld [vmem:[#allocation2 + $0x530] sm:$0xff]  ;;  %v113_v23 = vld [vmem:[#allocation2 + $0x2c0] sm:$0xff] }
  0x9f   :  { %1810 = vmatprep.subr.mxu0 %v416_v24 }
  0xa0   :  { %1811 = vmatpush3.msra.mxu0 %v416_v24  ;;  %v190_v24 = vld [vmem:[#allocation2 + $0x528] sm:$0xff] }
  0xa1   :  { %585 = vmatmul.mubr.f32.gmra.mxu0 %v120_v25  ;;  %890 = vmatmul.mubr.f32.gmra.mxu1 %v42_v26  ;;  %v112_v25 = vld [vmem:[#allocation2 + $0x2b8] sm:$0xff] }
  0xa2   :  { %589 = vmatprep.mubr.f32.mxu0 %v126_v27  ;;  %894 = vmatprep.mubr.f32.mxu1 %v48_v28  ;;  %v196_v26 = vld [vmem:[#allocation2 + $0x558] sm:$0xff]  ;;  %v118_v27 = vld [vmem:[#allocation2 + $0x2e8] sm:$0xff]  ;;  %v195_v28 = vld [vmem:[#allocation2 + $0x550] sm:$0xff] }
  0xa3   :  { %1812 = vmatprep.subr.mxu0 %v415_v29 }
  0xa4   :  { %1813 = vmatpush3.msra.mxu0 %v415_v29  ;;  %v117_v29 = vld [vmem:[#allocation2 + $0x2e0] sm:$0xff] }
  0xa5   :  { %590 = vmatmul.mubr.f32.gmra.mxu0 %v125_v30  ;;  %895 = vmatmul.mubr.f32.gmra.mxu1 %v47_v31  ;;  %v201_v30 = vld [vmem:[#allocation2 + $0x580] sm:$0xff]  ;;  %v123_v31 = vld [vmem:[#allocation2 + $0x310] sm:$0xff] }
  0xa6   :  { %594 = vmatprep.mubr.f32.mxu0 %v131_v32  ;;  %899 = vmatprep.mubr.f32.mxu1 %v53_v33  ;;  %v200_v32 = vld [vmem:[#allocation2 + $0x578] sm:$0xff]  ;;  %v122_v33 = vld [vmem:[#allocation2 + $0x308] sm:$0xff] }
  0xa7   :  { %1814 = vmatprep.subr.mxu0 %v414_v34 }
  0xa8   :  { %1815 = vmatpush3.msra.mxu0 %v414_v34  ;;  %v206_v34 = vld [vmem:[#allocation2 + $0x5a8] sm:$0xff] }
  0xa9   :  { %595 = vmatmul.mubr.f32.gmra.mxu0 %v130_v35  ;;  %900 = vmatmul.mubr.f32.gmra.mxu1 %v52_v36  ;;  %v128_v35 = vld [vmem:[#allocation2 + $0x338] sm:$0xff]  ;;  %v205_v36 = vld [vmem:[#allocation2 + $0x5a0] sm:$0xff] }
  0xaa   :  { %599 = vmatprep.mubr.f32.mxu0 %v136_v37  ;;  %904 = vmatprep.mubr.f32.mxu1 %v58_v38  ;;  %v127_v37 = vld [vmem:[#allocation2 + $0x330] sm:$0xff] }
  0xab   :  { %1816 = vmatprep.subr.mxu0 %v413_v39  ;;  %v211_v38 = vld [vmem:[#allocation2 + $0x5d0] sm:$0xff] }
  0xac   :  { %1817 = vmatpush3.msra.mxu0 %v413_v39  ;;  %v133_v39 = vld [vmem:[#allocation2 + $0x360] sm:$0xff] }
  0xad   :  { %600 = vmatmul.mubr.f32.gmra.mxu0 %v135_v40  ;;  %905 = vmatmul.mubr.f32.gmra.mxu1 %v57_v41  ;;  %v210_v40 = vld [vmem:[#allocation2 + $0x5c8] sm:$0xff]  ;;  %v132_v41 = vld [vmem:[#allocation2 + $0x358] sm:$0xff] }
  0xae   :  { %604 = vmatprep.mubr.f32.mxu0 %v141_v42  ;;  %909 = vmatprep.mubr.f32.mxu1 %v63_v43  ;;  %v216_v42 = vld [vmem:[#allocation2 + $0x5f8] sm:$0xff]  ;;  %v138_v43 = vld [vmem:[#allocation2 + $0x388] sm:$0xff] }
  0xaf   :  { %1818 = vmatprep.subr.mxu0 %v412_v44 }
  0xb0   :  { %1819 = vmatpush3.msra.mxu0 %v412_v44  ;;  %v215_v44 = vld [vmem:[#allocation2 + $0x5f0] sm:$0xff] }
  0xb1   :  { %605 = vmatmul.mubr.f32.gmra.mxu0 %v140_v45  ;;  %910 = vmatmul.mubr.f32.gmra.mxu1 %v62_v46  ;;  %v137_v45 = vld [vmem:[#allocation2 + $0x380] sm:$0xff] }
  0xb2   :  { %609 = vmatprep.mubr.f32.mxu0 %v146_v47  ;;  %914 = vmatprep.mubr.f32.mxu1 %v68_v48  ;;  %v221_v46 = vld [vmem:[#allocation2 + $0x620] sm:$0xff]  ;;  %v143_v47 = vld [vmem:[#allocation2 + $0x3b0] sm:$0xff]  ;;  %v220_v48 = vld [vmem:[#allocation2 + $0x618] sm:$0xff] }
  0xb3   :  { %1820 = vmatprep.subr.mxu0 %v411_v49 }
  0xb4   :  { %1821 = vmatpush3.msra.mxu0 %v411_v49  ;;  %v142_v49 = vld [vmem:[#allocation2 + $0x3a8] sm:$0xff] }
  0xb5   :  { %610 = vmatmul.mubr.f32.gmra.mxu0 %v145_v50  ;;  %915 = vmatmul.mubr.f32.gmra.mxu1 %v67_v51  ;;  %v226_v50 = vld [vmem:[#allocation2 + $0x648] sm:$0xff]  ;;  %v148_v51 = vld [vmem:[#allocation2 + $0x3d8] sm:$0xff] }
  0xb6   :  { %614 = vmatprep.mubr.f32.mxu0 %v151_v52  ;;  %919 = vmatprep.mubr.f32.mxu1 %v73_v53  ;;  %v225_v52 = vld [vmem:[#allocation2 + $0x640] sm:$0xff]  ;;  %v147_v53 = vld [vmem:[#allocation2 + $0x3d0] sm:$0xff] }
  0xb7   :  { %1822 = vmatprep.subr.mxu0 %v410_v54 }
  0xb8   :  { %1823 = vmatpush3.msra.mxu0 %v410_v54  ;;  %v231_v54 = vld [vmem:[#allocation2 + $0x670] sm:$0xff] }
  0xb9   :  { %615 = vmatmul.mubr.f32.gmra.mxu0 %v150_v55  ;;  %920 = vmatmul.mubr.f32.gmra.mxu1 %v72_v56  ;;  %v153_v55 = vld [vmem:[#allocation2 + $0x400] sm:$0xff]  ;;  %v230_v56 = vld [vmem:[#allocation2 + $0x668] sm:$0xff] }
  0xba   :  { %619 = vmatprep.mubr.f32.mxu0 %v156_v57  ;;  %924 = vmatprep.mubr.f32.mxu1 %v78_v58  ;;  %v152_v57 = vld [vmem:[#allocation2 + $0x3f8] sm:$0xff] }
  0xbb   :  { %1824 = vmatprep.subr.mxu0 %v409_v59  ;;  %v236_v58 = vld [vmem:[#allocation2 + $0x698] sm:$0xff] }
  0xbc   :  { %1825 = vmatpush3.msra.mxu0 %v409_v59  ;;  %v158_v59 = vld [vmem:[#allocation2 + $0x428] sm:$0xff] }
  0xbd   :  { %620 = vmatmul.mubr.f32.gmra.mxu0 %v155_v60  ;;  %925 = vmatmul.mubr.f32.gmra.mxu1 %v77_v61  ;;  %v235_v60 = vld [vmem:[#allocation2 + $0x690] sm:$0xff]  ;;  %v157_v61 = vld [vmem:[#allocation2 + $0x420] sm:$0xff] }
  0xbe   :  { %624 = vmatprep.mubr.f32.mxu0 %v161_v62  ;;  %929 = vmatprep.mubr.f32.mxu1 %v83_v63  ;;  %v241_v62 = vld [vmem:[#allocation2 + $0x6c0] sm:$0xff]  ;;  %v163_v63 = vld [vmem:[#allocation2 + $0x450] sm:$0xff] }
  0xc1   :  { %625 = vmatmul.mubr.f32.gmra.mxu0 %v160_v1  ;;  %930 = vmatmul.mubr.f32.gmra.mxu1 %v82_v2  ;;  %v240_v1 = vld [vmem:[#allocation2 + $0x6b8] sm:$0xff]  ;;  %v162_v2 = vld [vmem:[#allocation2 + $0x448] sm:$0xff] }
  0xc2   :  { %629 = vmatprep.mubr.f32.mxu0 %v166_v3  ;;  %934 = vmatprep.mubr.f32.mxu1 %v88_v4  ;;  %v246_v3 = vld [vmem:[#allocation2 + $0x6e8] sm:$0xff]  ;;  %v168_v4 = vld [vmem:[#allocation2 + $0x478] sm:$0xff] }
  0xc5   :  { %630 = vmatmul.mubr.f32.gmra.mxu0 %v165_v5  ;;  %935 = vmatmul.mubr.f32.gmra.mxu1 %v87_v6  ;;  %v245_v5 = vld [vmem:[#allocation2 + $0x6e0] sm:$0xff]  ;;  %v167_v6 = vld [vmem:[#allocation2 + $0x470] sm:$0xff] }
  0xc6   :  { %634 = vmatprep.mubr.f32.mxu0 %v171_v7  ;;  %939 = vmatprep.mubr.f32.mxu1 %v93_v8  ;;  %v251_v7 = vld [vmem:[#allocation2 + $0x710] sm:$0xff]  ;;  %v173_v8 = vld [vmem:[#allocation2 + $0x4a0] sm:$0xff] }
  0xc9   :  { %635 = vmatmul.mubr.f32.gmra.mxu0 %v170_v9  ;;  %940 = vmatmul.mubr.f32.gmra.mxu1 %v92_v10  ;;  %v250_v9 = vld [vmem:[#allocation2 + $0x708] sm:$0xff]  ;;  %v172_v10 = vld [vmem:[#allocation2 + $0x498] sm:$0xff] }
  0xca   :  { %639 = vmatprep.mubr.f32.mxu0 %v176_v11  ;;  %944 = vmatprep.mubr.f32.mxu1 %v98_v12  ;;  %v256_v11 = vld [vmem:[#allocation2 + $0x738] sm:$0xff]  ;;  %v178_v12 = vld [vmem:[#allocation2 + $0x4c8] sm:$0xff] }
  0xcd   :  { %640 = vmatmul.mubr.f32.gmra.mxu0 %v175_v13  ;;  %945 = vmatmul.mubr.f32.gmra.mxu1 %v97_v14  ;;  %v255_v13 = vld [vmem:[#allocation2 + $0x730] sm:$0xff]  ;;  %v177_v14 = vld [vmem:[#allocation2 + $0x4c0] sm:$0xff] }
  0xce   :  { %644 = vmatprep.mubr.f32.mxu0 %v181_v15  ;;  %949 = vmatprep.mubr.f32.mxu1 %v103_v16  ;;  %v261_v15 = vld [vmem:[#allocation2 + $0x760] sm:$0xff]  ;;  %v183_v16 = vld [vmem:[#allocation2 + $0x4f0] sm:$0xff] }
  0xd1   :  { %645 = vmatmul.mubr.f32.gmra.mxu0 %v180_v17  ;;  %950 = vmatmul.mubr.f32.gmra.mxu1 %v102_v18  ;;  %v260_v17 = vld [vmem:[#allocation2 + $0x758] sm:$0xff]  ;;  %v182_v18 = vld [vmem:[#allocation2 + $0x4e8] sm:$0xff] }
  0xd2   :  { %649 = vmatprep.mubr.f32.mxu0 %v186_v19  ;;  %954 = vmatprep.mubr.f32.mxu1 %v108_v0  ;;  %v188_v19 = vld [vmem:[#allocation2 + $0x518] sm:$0xff]  ;;  %v29_v0 = vld [vmem:[#allocation2 + $0x20] sm:$0xff] }
  0xd5   :  { %650 = vmatmul.mubr.f32.gmra.mxu0 %v185_v20  ;;  %955 = vmatmul.mubr.f32.gmra.mxu1 %v107_v21 }
  0xd6   :  { %654 = vmatprep.mubr.f32.mxu0 %v191_v22  ;;  %959 = vmatprep.mubr.f32.mxu1 %v113_v23 }
  0xd9   :  { %655 = vmatmul.mubr.f32.gmra.mxu0 %v190_v24  ;;  %960 = vmatmul.mubr.f32.gmra.mxu1 %v112_v25  ;;  %v187_v24 = vld [vmem:[#allocation2 + $0x510] sm:$0xff]  ;;  %v34_v25 = vld [vmem:[#allocation2 + $0x48] sm:$0xff] }
  0xda   :  { %659 = vmatprep.mubr.f32.mxu0 %v196_v26  ;;  %964 = vmatprep.mubr.f32.mxu1 %v118_v27  ;;  %v193_v26 = vld [vmem:[#allocation2 + $0x540] sm:$0xff]  ;;  %v39_v27 = vld [vmem:[#allocation2 + $0x70] sm:$0xff] }
  0xdd   :  { %660 = vmatmul.mubr.f32.gmra.mxu0 %v195_v28  ;;  %965 = vmatmul.mubr.f32.gmra.mxu1 %v117_v29 }
  0xde   :  { %664 = vmatprep.mubr.f32.mxu0 %v201_v30  ;;  %969 = vmatprep.mubr.f32.mxu1 %v123_v31  ;;  %v192_v30 = vld [vmem:[#allocation2 + $0x538] sm:$0xff] }
  0xdf   :  { %v44_v31 = vld [vmem:[#allocation2 + $0x98] sm:$0xff] }
  0xe1   :  { %665 = vmatmul.mubr.f32.gmra.mxu0 %v200_v32  ;;  %970 = vmatmul.mubr.f32.gmra.mxu1 %v122_v33 }
  0xe2   :  { %669 = vmatprep.mubr.f32.mxu0 %v206_v34  ;;  %974 = vmatprep.mubr.f32.mxu1 %v128_v35  ;;  %v198_v34 = vld [vmem:[#allocation2 + $0x568] sm:$0xff]  ;;  %v49_v35 = vld [vmem:[#allocation2 + $0xc0] sm:$0xff] }
  0xe5   :  { %670 = vmatmul.mubr.f32.gmra.mxu0 %v205_v36  ;;  %975 = vmatmul.mubr.f32.gmra.mxu1 %v127_v37 }
  0xe6   :  { %674 = vmatprep.mubr.f32.mxu0 %v211_v38  ;;  %979 = vmatprep.mubr.f32.mxu1 %v133_v39  ;;  %v197_v38 = vld [vmem:[#allocation2 + $0x560] sm:$0xff]  ;;  %v54_v39 = vld [vmem:[#allocation2 + $0xe8] sm:$0xff] }
  0xe9   :  { %675 = vmatmul.mubr.f32.gmra.mxu0 %v210_v40  ;;  %980 = vmatmul.mubr.f32.gmra.mxu1 %v132_v41 }
  0xea   :  { %679 = vmatprep.mubr.f32.mxu0 %v216_v42  ;;  %984 = vmatprep.mubr.f32.mxu1 %v138_v43  ;;  %v203_v42 = vld [vmem:[#allocation2 + $0x590] sm:$0xff] }
  0xeb   :  { %v59_v43 = vld [vmem:[#allocation2 + $0x110] sm:$0xff] }
  0xed   :  { %680 = vmatmul.mubr.f32.gmra.mxu0 %v215_v44  ;;  %985 = vmatmul.mubr.f32.gmra.mxu1 %v137_v45 }
  0xee   :  { %684 = vmatprep.mubr.f32.mxu0 %v221_v46  ;;  %989 = vmatprep.mubr.f32.mxu1 %v143_v47  ;;  %v202_v46 = vld [vmem:[#allocation2 + $0x588] sm:$0xff]  ;;  %v64_v47 = vld [vmem:[#allocation2 + $0x138] sm:$0xff] }
  0xf1   :  { %685 = vmatmul.mubr.f32.gmra.mxu0 %v220_v48  ;;  %990 = vmatmul.mubr.f32.gmra.mxu1 %v142_v49 }
  0xf2   :  { %689 = vmatprep.mubr.f32.mxu0 %v226_v50  ;;  %994 = vmatprep.mubr.f32.mxu1 %v148_v51  ;;  %v208_v50 = vld [vmem:[#allocation2 + $0x5b8] sm:$0xff]  ;;  %v69_v51 = vld [vmem:[#allocation2 + $0x160] sm:$0xff] }
  0xf5   :  { %690 = vmatmul.mubr.f32.gmra.mxu0 %v225_v52  ;;  %995 = vmatmul.mubr.f32.gmra.mxu1 %v147_v53 }
  0xf6   :  { %694 = vmatprep.mubr.f32.mxu0 %v231_v54  ;;  %999 = vmatprep.mubr.f32.mxu1 %v153_v55  ;;  %v207_v54 = vld [vmem:[#allocation2 + $0x5b0] sm:$0xff]  ;;  %v74_v55 = vld [vmem:[#allocation2 + $0x188] sm:$0xff] }
  0xf9   :  { %695 = vmatmul.mubr.f32.gmra.mxu0 %v230_v56  ;;  %1000 = vmatmul.mubr.f32.gmra.mxu1 %v152_v57 }
  0xfa   :  { %699 = vmatprep.mubr.f32.mxu0 %v236_v58  ;;  %1004 = vmatprep.mubr.f32.mxu1 %v158_v59  ;;  %v213_v58 = vld [vmem:[#allocation2 + $0x5e0] sm:$0xff]  ;;  %v79_v59 = vld [vmem:[#allocation2 + $0x1b0] sm:$0xff] }
  0xfd   :  { %700 = vmatmul.mubr.f32.gmra.mxu0 %v235_v60  ;;  %1005 = vmatmul.mubr.f32.gmra.mxu1 %v157_v61 }
  0xfe   :  { %704 = vmatprep.mubr.f32.mxu0 %v241_v62  ;;  %1009 = vmatprep.mubr.f32.mxu1 %v163_v63  ;;  %v212_v62 = vld [vmem:[#allocation2 + $0x5d8] sm:$0xff] }
  0xff   :  { %v84_v63 = vld [vmem:[#allocation2 + $0x1d8] sm:$0xff] }
 0x101   :  { %705 = vmatmul.mubr.f32.gmra.mxu0 %v240_v1  ;;  %1010 = vmatmul.mubr.f32.gmra.mxu1 %v162_v2  ;;  %v218_v2 = vld [vmem:[#allocation2 + $0x608] sm:$0xff] }
 0x102   :  { %709 = vmatprep.mubr.f32.mxu0 %v246_v3  ;;  %1014 = vmatprep.mubr.f32.mxu1 %v168_v4  ;;  %v89_v3 = vld [vmem:[#allocation2 + $0x200] sm:$0xff] }
 0x105   :  { %710 = vmatmul.mubr.f32.gmra.mxu0 %v245_v5  ;;  %1015 = vmatmul.mubr.f32.gmra.mxu1 %v167_v6 }
 0x106   :  { %714 = vmatprep.mubr.f32.mxu0 %v251_v7  ;;  %1019 = vmatprep.mubr.f32.mxu1 %v173_v8  ;;  %v217_v7 = vld [vmem:[#allocation2 + $0x600] sm:$0xff]  ;;  %v94_v8 = vld [vmem:[#allocation2 + $0x228] sm:$0xff] }
 0x109   :  { %715 = vmatmul.mubr.f32.gmra.mxu0 %v250_v9  ;;  %1020 = vmatmul.mubr.f32.gmra.mxu1 %v172_v10  ;;  %v223_v10 = vld [vmem:[#allocation2 + $0x630] sm:$0xff] }
 0x10a   :  { %719 = vmatprep.mubr.f32.mxu0 %v256_v11  ;;  %1024 = vmatprep.mubr.f32.mxu1 %v178_v12  ;;  %v99_v11 = vld [vmem:[#allocation2 + $0x250] sm:$0xff] }
 0x10d   :  { %720 = vmatmul.mubr.f32.gmra.mxu0 %v255_v13  ;;  %1025 = vmatmul.mubr.f32.gmra.mxu1 %v177_v14 }
 0x10e   :  { %724 = vmatprep.mubr.f32.mxu0 %v261_v15  ;;  %1029 = vmatprep.mubr.f32.mxu1 %v183_v16  ;;  %v222_v15 = vld [vmem:[#allocation2 + $0x628] sm:$0xff]  ;;  %v104_v16 = vld [vmem:[#allocation2 + $0x278] sm:$0xff] }
 0x10f   :  { %v2370_v20 = vpop.f32.mrf.mxu0  ;;  %v2372_v21 = vpop.f32.mrf.mxu1 }
 0x110   :  { %2980 = vst [vmem:[#allocation5_spill] sm:$0xff] %v2372_v21 }
 0x111   :  { %725 = vmatmul.mubr.f32.gmra.mxu0 %v260_v17  ;;  %1030 = vmatmul.mubr.f32.gmra.mxu1 %v182_v18  ;;  %v493_v22 = vpop.f32.mrf.mxu0  ;;  %v733_v23 = vpop.f32.mrf.mxu1  ;;  %v228_v17 = vld [vmem:[#allocation2 + $0x658] sm:$0xff]  ;;  %v109_v18 = vld [vmem:[#allocation2 + $0x2a0] sm:$0xff] }
 0x112   :  { %1034 = vmatprep.mubr.f32.mxu1 %v188_v19  ;;  %1826 = vmatprep.mubr.f32.mxu0 %v29_v0  ;;  %v227_v23 = vld [vmem:[#allocation2 + $0x650] sm:$0xff] }
 0x114   :  { %v2374_v28 = vpop.f32.mrf.mxu0  ;;  %v2376_v29 = vpop.f32.mrf.mxu1 }
 0x115   :  { %2981 = vst [vmem:[#allocation6_spill] sm:$0xff] %v2376_v29  ;;  %1035 = vmatmul.mubr.f32.gmra.mxu1 %v187_v24  ;;  %1827 = vmatmul.mubr.f32.vlgmr.msra.gmra.mxu0 %v34_v25  ;;  %v114_v24 = vld [vmem:[#allocation2 + $0x2c8] sm:$0xff] }
 0x116   :  { %1039 = vmatprep.mubr.f32.mxu1 %v193_v26  ;;  %1829 = vmatprep.mubr.f32.mxu0 %v39_v27  ;;  %v498_v32 = vpop.f32.mrf.mxu0  ;;  %v738_v33 = vpop.f32.mrf.mxu1  ;;  %v233_v26 = vld [vmem:[#allocation2 + $0x680] sm:$0xff]  ;;  %v119_v27 = vld [vmem:[#allocation2 + $0x2f0] sm:$0xff] }
 0x117   :  { %v232_v33 = vld [vmem:[#allocation2 + $0x678] sm:$0xff] }
 0x118   :  { %v2378_v36 = vpop.f32.mrf.mxu0 }
 0x119   :  { %1040 = vmatmul.mubr.f32.gmra.mxu1 %v192_v30  ;;  %1830 = vmatmul.mubr.f32.gmra.mxu0 %v44_v31  ;;  %v2380_v37 = vpop.f32.mrf.mxu1 }
 0x11a   :  { %2982 = vst [vmem:[#allocation7_spill] sm:$0xff] %v2380_v37  ;;  %1044 = vmatprep.mubr.f32.mxu1 %v198_v34  ;;  %1832 = vmatprep.mubr.f32.mxu0 %v49_v35  ;;  %v503_v40 = vpop.f32.mrf.mxu0  ;;  %v124_v34 = vld [vmem:[#allocation2 + $0x318] sm:$0xff] }
 0x11b   :  { %v743_v41 = vpop.f32.mrf.mxu1 }
 0x11c   :  { %v2382_v44 = vpop.f32.mrf.mxu0 }
 0x11d   :  { %1045 = vmatmul.mubr.f32.gmra.mxu1 %v197_v38  ;;  %1833 = vmatmul.mubr.f32.gmra.mxu0 %v54_v39  ;;  %v2384_v45 = vpop.f32.mrf.mxu1  ;;  %v238_v38 = vld [vmem:[#allocation2 + $0x6a8] sm:$0xff]  ;;  %v129_v39 = vld [vmem:[#allocation2 + $0x340] sm:$0xff] }
 0x11e   :  { %2983 = vst [vmem:[#allocation8_spill] sm:$0xff] %v2384_v45  ;;  %1049 = vmatprep.mubr.f32.mxu1 %v203_v42  ;;  %1835 = vmatprep.mubr.f32.mxu0 %v59_v43  ;;  %v508_v48 = vpop.f32.mrf.mxu0  ;;  %v237_v42 = vld [vmem:[#allocation2 + $0x6a0] sm:$0xff]  ;;  %v134_v43 = vld [vmem:[#allocation2 + $0x368] sm:$0xff] }
 0x11f   :  { %v748_v49 = vpop.f32.mrf.mxu1  ;;  %v243_v48 = vld [vmem:[#allocation2 + $0x6d0] sm:$0xff] }
 0x120   :  { %v139_v49 = vld [vmem:[#allocation2 + $0x390] sm:$0xff] }
 0x121   :  { %1050 = vmatmul.mubr.f32.gmra.mxu1 %v202_v46  ;;  %1836 = vmatmul.mubr.f32.gmra.mxu0 %v64_v47  ;;  %v2386_v52 = vpop.f32.mrf.mxu0  ;;  %v2388_v53 = vpop.f32.mrf.mxu1 }
 0x122   :  { %2984 = vst [vmem:[#allocation9_spill] sm:$0xff] %v2388_v53  ;;  %1054 = vmatprep.mubr.f32.mxu1 %v208_v50  ;;  %1838 = vmatprep.mubr.f32.mxu0 %v69_v51 }
 0x123   :  { %v513_v56 = vpop.f32.mrf.mxu0  ;;  %v753_v57 = vpop.f32.mrf.mxu1 }
 0x124   :  { %v248_v57 = vld [vmem:[#allocation2 + $0x6f8] sm:$0xff] }
 0x125   :  { %1055 = vmatmul.mubr.f32.gmra.mxu1 %v207_v54  ;;  %1839 = vmatmul.mubr.f32.gmra.mxu0 %v74_v55  ;;  %v2390_v60 = vpop.f32.mrf.mxu0  ;;  %v242_v54 = vld [vmem:[#allocation2 + $0x6c8] sm:$0xff]  ;;  %v144_v55 = vld [vmem:[#allocation2 + $0x3b8] sm:$0xff] }
 0x126   :  { %1059 = vmatprep.mubr.f32.mxu1 %v213_v58  ;;  %1841 = vmatprep.mubr.f32.mxu0 %v79_v59  ;;  %v2392_v61 = vpop.f32.mrf.mxu1  ;;  %v149_v58 = vld [vmem:[#allocation2 + $0x3e0] sm:$0xff] }
 0x127   :  { %2985 = vst [vmem:[#allocation10_spill] sm:$0xff] %v2392_v61  ;;  %v518_v1 = vpop.f32.mrf.mxu0 }
 0x128   :  { %v758_v4 = vpop.f32.mrf.mxu1  ;;  %v247_v1 = vld [vmem:[#allocation2 + $0x6f0] sm:$0xff] }
 0x129   :  { %1060 = vmatmul.mubr.f32.gmra.mxu1 %v212_v62  ;;  %1842 = vmatmul.mubr.f32.gmra.mxu0 %v84_v63  ;;  %v2394_v5 = vpop.f32.mrf.mxu0  ;;  %v253_v4 = vld [vmem:[#allocation2 + $0x720] sm:$0xff] }
 0x12a   :  { %1064 = vmatprep.mubr.f32.mxu1 %v218_v2  ;;  %1844 = vmatprep.mubr.f32.mxu0 %v89_v3  ;;  %v2396_v6 = vpop.f32.mrf.mxu1  ;;  %v154_v2 = vld [vmem:[#allocation2 + $0x408] sm:$0xff] }
 0x12b   :  { %2986 = vst [vmem:[#allocation11_spill] sm:$0xff] %v2396_v6  ;;  %v523_v9 = vpop.f32.mrf.mxu0  ;;  %v339_v6 = vld [vmem:[#allocation2 + $0x9d0] sm:$0xff] }
 0x12c   :  { %v763_v12 = vpop.f32.mrf.mxu1 }
 0x12d   :  { %1065 = vmatmul.mubr.f32.gmra.mxu1 %v217_v7  ;;  %1845 = vmatmul.mubr.f32.gmra.mxu0 %v94_v8  ;;  %v159_v7 = vld [vmem:[#allocation2 + $0x430] sm:$0xff]  ;;  %v164_v12 = vld [vmem:[#allocation2 + $0x458] sm:$0xff] }
 0x12e   :  { %1069 = vmatprep.mubr.f32.mxu1 %v223_v10  ;;  %1847 = vmatprep.mubr.f32.mxu0 %v99_v11  ;;  %v2398_v13 = vpop.f32.mrf.mxu0  ;;  %v2400_v14 = vpop.f32.mrf.mxu1  ;;  %v252_v11 = vld [vmem:[#allocation2 + $0x718] sm:$0xff] }
 0x12f   :  { %2987 = vst [vmem:[#allocation12_spill] sm:$0xff] %v2400_v14 }
 0x130   :  { %v528_v19 = vpop.f32.mrf.mxu0  ;;  %v768_v0 = vpop.f32.mrf.mxu1 }
 0x131   :  { %1070 = vmatmul.mubr.f32.gmra.mxu1 %v222_v15  ;;  %1848 = vmatmul.mubr.f32.gmra.mxu0 %v104_v16  ;;  %v258_v15 = vld [vmem:[#allocation2 + $0x748] sm:$0xff]  ;;  %v169_v16 = vld [vmem:[#allocation2 + $0x480] sm:$0xff] }
 0x132   :  { %1074 = vmatprep.mubr.f32.mxu1 %v228_v17  ;;  %1850 = vmatprep.mubr.f32.mxu0 %v109_v18  ;;  %v2402_v22 = vpop.f32.mrf.mxu0 }
 0x133   :  { %v2404_v25 = vpop.f32.mrf.mxu1 }
 0x134   :  { %2988 = vst [vmem:[#allocation13_spill] sm:$0xff] %v2404_v25  ;;  %v533_v30 = vpop.f32.mrf.mxu0 }
 0x135   :  { %1075 = vmatmul.mubr.f32.gmra.mxu1 %v227_v23  ;;  %1851 = vmatmul.mubr.f32.gmra.mxu0 %v114_v24  ;;  %v773_v31 = vpop.f32.mrf.mxu1  ;;  %v257_v23 = vld [vmem:[#allocation2 + $0x740] sm:$0xff]  ;;  %v174_v24 = vld [vmem:[#allocation2 + $0x4a8] sm:$0xff] }
 0x136   :  { %1079 = vmatprep.mubr.f32.mxu1 %v233_v26  ;;  %1853 = vmatprep.mubr.f32.mxu0 %v119_v27  ;;  %v2406_v32 = vpop.f32.mrf.mxu0  ;;  %v263_v26 = vld [vmem:[#allocation2 + $0x770] sm:$0xff] }
 0x137   :  { %v2408_v35 = vpop.f32.mrf.mxu1  ;;  %v179_v27 = vld [vmem:[#allocation2 + $0x4d0] sm:$0xff] }
 0x138   :  { %2989 = vst [vmem:[#allocation14_spill] sm:$0xff] %v2408_v35  ;;  %v538_v40 = vpop.f32.mrf.mxu0  ;;  %v343_v35 = vld [vmem:[#allocation2 + $0x9f0] sm:$0xff] }
 0x139   :  { %1080 = vmatmul.mubr.f32.gmra.mxu1 %v232_v33  ;;  %1854 = vmatmul.mubr.f32.gmra.mxu0 %v124_v34  ;;  %v778_v41 = vpop.f32.mrf.mxu1  ;;  %v262_v34 = vld [vmem:[#allocation2 + $0x768] sm:$0xff]  ;;  %v268_v40 = vld [vmem:[#allocation2 + $0x798] sm:$0xff] }
 0x13a   :  { %1084 = vmatprep.mubr.f32.mxu1 %v238_v38  ;;  %1856 = vmatprep.mubr.f32.mxu0 %v129_v39  ;;  %v184_v38 = vld [vmem:[#allocation2 + $0x4f8] sm:$0xff]  ;;  %v189_v41 = vld [vmem:[#allocation2 + $0x520] sm:$0xff] }
 0x13b   :  { %v2410_v46 = vpop.f32.mrf.mxu0  ;;  %v2412_v47 = vpop.f32.mrf.mxu1 }
 0x13c   :  { %2990 = vst [vmem:[#allocation15_spill] sm:$0xff] %v2412_v47 }
 0x13d   :  { %1085 = vmatmul.mubr.f32.gmra.mxu1 %v237_v42  ;;  %1857 = vmatmul.mubr.f32.gmra.mxu0 %v134_v43  ;;  %v543_v50 = vpop.f32.mrf.mxu0  ;;  %v783_v51 = vpop.f32.mrf.mxu1 }
 0x13e   :  { %1089 = vmatprep.mubr.f32.mxu1 %v243_v48  ;;  %1859 = vmatprep.mubr.f32.mxu0 %v139_v49  ;;  %v267_v49 = vld [vmem:[#allocation2 + $0x790] sm:$0xff]  ;;  %v194_v50 = vld [vmem:[#allocation2 + $0x548] sm:$0xff] }
 0x13f   :  { %v2414_v56 = vpop.f32.mrf.mxu0 }
 0x140   :  { %v2416_v59 = vpop.f32.mrf.mxu1 }
 0x141   :  { %2991 = vst [vmem:[#allocation16_spill] sm:$0xff] %v2416_v59  ;;  %1090 = vmatmul.mubr.f32.gmra.mxu1 %v242_v54  ;;  %1860 = vmatmul.mubr.f32.gmra.mxu0 %v144_v55  ;;  %v548_v62 = vpop.f32.mrf.mxu0  ;;  %v273_v54 = vld [vmem:[#allocation2 + $0x7c0] sm:$0xff]  ;;  %v199_v55 = vld [vmem:[#allocation2 + $0x570] sm:$0xff]  ;;  %v324_v59 = vld [vmem:[#allocation2 + $0x958] sm:$0xff] }
 0x142   :  { %v788_v63 = vpop.f32.mrf.mxu1  ;;  %1094 = vmatprep.mubr.f32.mxu1 %v248_v57  ;;  %1862 = vmatprep.mubr.f32.mxu0 %v149_v58  ;;  %v272_v62 = vld [vmem:[#allocation2 + $0x7b8] sm:$0xff] }
 0x143   :  { %v2418_v3 = vpop.f32.mrf.mxu0  ;;  %v204_v63 = vld [vmem:[#allocation2 + $0x598] sm:$0xff] }
 0x144   :  { %v2420_v8 = vpop.f32.mrf.mxu1 }
 0x145   :  { %2992 = vst [vmem:[#allocation17_spill] sm:$0xff] %v2420_v8  ;;  %1095 = vmatmul.mubr.f32.gmra.mxu1 %v247_v1  ;;  %1863 = vmatmul.mubr.f32.gmra.mxu0 %v154_v2  ;;  %v553_v9 = vpop.f32.mrf.mxu0 }
 0x146   :  { %v793_v10 = vpop.f32.mrf.mxu1  ;;  %1099 = vmatprep.mubr.f32.mxu1 %v253_v4  ;;  %1865 = vmatprep.mubr.f32.mxu0 %v159_v7  ;;  %v278_v4 = vld [vmem:[#allocation2 + $0x7e8] sm:$0xff]  ;;  %v209_v7 = vld [vmem:[#allocation2 + $0x5c0] sm:$0xff] }
 0x148   :  { %v2422_v17 = vpop.f32.mrf.mxu0  ;;  %v2424_v18 = vpop.f32.mrf.mxu1 }
 0x149   :  { %2993 = vst [vmem:[#allocation18_spill] sm:$0xff] %v2424_v18  ;;  %1100 = vmatmul.mubr.f32.gmra.mxu1 %v252_v11  ;;  %1866 = vmatmul.mubr.f32.gmra.mxu0 %v164_v12  ;;  %v277_v11 = vld [vmem:[#allocation2 + $0x7e0] sm:$0xff]  ;;  %v214_v12 = vld [vmem:[#allocation2 + $0x5e8] sm:$0xff] }
 0x14a   :  { %v558_v19 = vpop.f32.mrf.mxu0  ;;  %v798_v0 = vpop.f32.mrf.mxu1  ;;  %1104 = vmatprep.mubr.f32.mxu1 %v258_v15  ;;  %1868 = vmatprep.mubr.f32.mxu0 %v169_v16  ;;  %v314_v18 = vld [vmem:[#allocation2 + $0x908] sm:$0xff] }
 0x14b   :  { %v283_v19 = vld [vmem:[#allocation2 + $0x810] sm:$0xff] }
 0x14c   :  { %v2426_v30 = vpop.f32.mrf.mxu0  ;;  %v219_v0 = vld [vmem:[#allocation2 + $0x610] sm:$0xff] }
 0x14d   :  { %v2428_v31 = vpop.f32.mrf.mxu1  ;;  %1105 = vmatmul.mubr.f32.gmra.mxu1 %v257_v23  ;;  %1869 = vmatmul.mubr.f32.gmra.mxu0 %v174_v24 }
 0x14e   :  { %2994 = vst [vmem:[#allocation19_spill] sm:$0xff] %v2428_v31  ;;  %v563_v33 = vpop.f32.mrf.mxu0  ;;  %1109 = vmatprep.mubr.f32.mxu1 %v263_v26  ;;  %1871 = vmatprep.mubr.f32.mxu0 %v179_v27  ;;  %v282_v26 = vld [vmem:[#allocation2 + $0x808] sm:$0xff]  ;;  %v224_v27 = vld [vmem:[#allocation2 + $0x638] sm:$0xff] }
 0x14f   :  { %v803_v39 = vpop.f32.mrf.mxu1  ;;  %v304_v31 = vld [vmem:[#allocation2 + $0x8b8] sm:$0xff] }
 0x150   :  { %v2430_v42 = vpop.f32.mrf.mxu0  ;;  %v229_v39 = vld [vmem:[#allocation2 + $0x660] sm:$0xff] }
 0x151   :  { %v2432_v43 = vpop.f32.mrf.mxu1  ;;  %1110 = vmatmul.mubr.f32.gmra.mxu1 %v262_v34  ;;  %1872 = vmatmul.mubr.f32.gmra.mxu0 %v184_v38  ;;  %v288_v38 = vld [vmem:[#allocation2 + $0x838] sm:$0xff] }
 0x152   :  { %2995 = vst [vmem:[#allocation20_spill] sm:$0xff] %v2432_v43  ;;  %v568_v48 = vpop.f32.mrf.mxu0  ;;  %1114 = vmatprep.mubr.f32.mxu1 %v268_v40  ;;  %1874 = vmatprep.mubr.f32.mxu0 %v189_v41 }
 0x153   :  { %v808_v51 = vpop.f32.mrf.mxu1  ;;  %v287_v48 = vld [vmem:[#allocation2 + $0x830] sm:$0xff] }
 0x155   :  { %v2434_v57 = vpop.f32.mrf.mxu0  ;;  %v2436_v58 = vpop.f32.mrf.mxu1  ;;  %1115 = vmatmul.mubr.f32.gmra.mxu1 %v267_v49  ;;  %1875 = vmatmul.mubr.f32.gmra.mxu0 %v194_v50  ;;  %v234_v49 = vld [vmem:[#allocation2 + $0x688] sm:$0xff] }
 0x156   :  { %1119 = vmatprep.mubr.f32.mxu1 %v273_v54  ;;  %1877 = vmatprep.mubr.f32.mxu0 %v199_v55  ;;  %v293_v54 = vld [vmem:[#allocation2 + $0x860] sm:$0xff]  ;;  %v239_v55 = vld [vmem:[#allocation2 + $0x6b0] sm:$0xff] }
 0x157   :  { %v573_v1 = vpop.f32.mrf.mxu0  ;;  %v878_v2 = vpop.f32.mrf.mxu1 }
 0x158   :  { %v292_v1 = vld [vmem:[#allocation2 + $0x858] sm:$0xff] }
 0x159   :  { %v2438_v9 = vpop.f32.mrf.mxu0  ;;  %v2440_v10 = vpop.f32.mrf.mxu1  ;;  %1120 = vmatmul.mubr.f32.gmra.mxu1 %v272_v62  ;;  %1878 = vmatmul.mubr.f32.gmra.mxu0 %v204_v63  ;;  %v244_v2 = vld [vmem:[#allocation2 + $0x6d8] sm:$0xff] }
 0x15a   :  { %1124 = vmatprep.mubr.f32.mxu1 %v278_v4  ;;  %1880 = vmatprep.mubr.f32.mxu0 %v209_v7 }
 0x15b   :  { %v578_v15 = vpop.f32.mrf.mxu0  ;;  %v883_v16 = vpop.f32.mrf.mxu1 }
 0x15d   :  { %v2442_v23 = vpop.f32.mrf.mxu0  ;;  %v2444_v24 = vpop.f32.mrf.mxu1  ;;  %1125 = vmatmul.mubr.f32.gmra.mxu1 %v277_v11  ;;  %1881 = vmatmul.mubr.f32.gmra.mxu0 %v214_v12  ;;  %v298_v11 = vld [vmem:[#allocation2 + $0x888] sm:$0xff]  ;;  %v249_v12 = vld [vmem:[#allocation2 + $0x700] sm:$0xff] }
 0x15e   :  { %1129 = vmatprep.mubr.f32.mxu1 %v283_v19  ;;  %1883 = vmatprep.mubr.f32.mxu0 %v219_v0  ;;  %v297_v19 = vld [vmem:[#allocation2 + $0x880] sm:$0xff]  ;;  %v254_v0 = vld [vmem:[#allocation2 + $0x728] sm:$0xff] }
 0x15f   :  { %v583_v33 = vpop.f32.mrf.mxu0  ;;  %v888_v34 = vpop.f32.mrf.mxu1 }
 0x160   :  { %v303_v33 = vld [vmem:[#allocation2 + $0x8b0] sm:$0xff] }
 0x161   :  { %v2446_v40 = vpop.f32.mrf.mxu0  ;;  %v2448_v41 = vpop.f32.mrf.mxu1  ;;  %1130 = vmatmul.mubr.f32.gmra.mxu1 %v282_v26  ;;  %1884 = vmatmul.mubr.f32.gmra.mxu0 %v224_v27  ;;  %v259_v34 = vld [vmem:[#allocation2 + $0x750] sm:$0xff] }
 0x162   :  { %1134 = vmatprep.mubr.f32.mxu1 %v288_v38  ;;  %1886 = vmatprep.mubr.f32.mxu0 %v229_v39 }
 0x163   :  { %v588_v50 = vpop.f32.mrf.mxu0  ;;  %v893_v51 = vpop.f32.mrf.mxu1 }
 0x165   :  { %v2450_v62 = vpop.f32.mrf.mxu0  ;;  %v2452_v63 = vpop.f32.mrf.mxu1  ;;  %1135 = vmatmul.mubr.f32.gmra.mxu1 %v287_v48  ;;  %1887 = vmatmul.mubr.f32.gmra.mxu0 %v234_v49  ;;  %v302_v48 = vld [vmem:[#allocation2 + $0x8a8] sm:$0xff]  ;;  %v264_v49 = vld [vmem:[#allocation2 + $0x778] sm:$0xff] }
 0x166   :  { %1139 = vmatprep.mubr.f32.mxu1 %v293_v54  ;;  %1889 = vmatprep.mubr.f32.mxu0 %v239_v55  ;;  %v308_v54 = vld [vmem:[#allocation2 + $0x8d8] sm:$0xff]  ;;  %v269_v55 = vld [vmem:[#allocation2 + $0x7a0] sm:$0xff] }
 0x167   :  { %v593_v4 = vpop.f32.mrf.mxu0  ;;  %v898_v7 = vpop.f32.mrf.mxu1 }
 0x168   :  { %v307_v4 = vld [vmem:[#allocation2 + $0x8d0] sm:$0xff]  ;;  %v274_v7 = vld [vmem:[#allocation2 + $0x7c8] sm:$0xff] }
 0x169   :  { %v2454_v15 = vpop.f32.mrf.mxu0  ;;  %v2456_v16 = vpop.f32.mrf.mxu1  ;;  %1140 = vmatmul.mubr.f32.gmra.mxu1 %v292_v1  ;;  %1890 = vmatmul.mubr.f32.gmra.mxu0 %v244_v2 }
 0x16a   :  { %1144 = vmatprep.mubr.f32.mxu1 %v298_v11  ;;  %1892 = vmatprep.mubr.f32.mxu0 %v249_v12 }
 0x16b   :  { %v598_v26 = vpop.f32.mrf.mxu0  ;;  %v903_v27 = vpop.f32.mrf.mxu1 }
 0x16d   :  { %v2458_v38 = vpop.f32.mrf.mxu0  ;;  %v2460_v39 = vpop.f32.mrf.mxu1  ;;  %1145 = vmatmul.mubr.f32.gmra.mxu1 %v297_v19  ;;  %1893 = vmatmul.mubr.f32.gmra.mxu0 %v254_v0  ;;  %v313_v19 = vld [vmem:[#allocation2 + $0x900] sm:$0xff]  ;;  %v279_v0 = vld [vmem:[#allocation2 + $0x7f0] sm:$0xff] }
 0x16e   :  { %1149 = vmatprep.mubr.f32.mxu1 %v303_v33  ;;  %1895 = vmatprep.mubr.f32.mxu0 %v259_v34  ;;  %v312_v33 = vld [vmem:[#allocation2 + $0x8f8] sm:$0xff] }
 0x16f   :  { %v603_v50 = vpop.f32.mrf.mxu0  ;;  %v908_v51 = vpop.f32.mrf.mxu1  ;;  %v284_v34 = vld [vmem:[#allocation2 + $0x818] sm:$0xff] }
 0x170   :  { %v318_v50 = vld [vmem:[#allocation2 + $0x928] sm:$0xff]  ;;  %v289_v51 = vld [vmem:[#allocation2 + $0x840] sm:$0xff] }
 0x171   :  { %v2462_v1 = vpop.f32.mrf.mxu0  ;;  %v2464_v2 = vpop.f32.mrf.mxu1  ;;  %1150 = vmatmul.mubr.f32.gmra.mxu1 %v302_v48  ;;  %1896 = vmatmul.mubr.f32.gmra.mxu0 %v264_v49 }
 0x172   :  { %1154 = vmatprep.mubr.f32.mxu1 %v308_v54  ;;  %1898 = vmatprep.mubr.f32.mxu0 %v269_v55 }
 0x173   :  { %v608_v11 = vpop.f32.mrf.mxu0  ;;  %v913_v12 = vpop.f32.mrf.mxu1 }
 0x174   :  { %v317_v11 = vld [vmem:[#allocation2 + $0x920] sm:$0xff]  ;;  %v294_v12 = vld [vmem:[#allocation2 + $0x868] sm:$0xff] }
 0x175   :  { %v2466_v26 = vpop.f32.mrf.mxu0  ;;  %v2468_v27 = vpop.f32.mrf.mxu1  ;;  %1155 = vmatmul.mubr.f32.gmra.mxu1 %v307_v4  ;;  %1899 = vmatmul.mubr.f32.gmra.mxu0 %v274_v7 }
 0x176   :  { %1159 = vmatprep.mubr.f32.mxu1 %v313_v19  ;;  %1901 = vmatprep.mubr.f32.mxu0 %v279_v0  ;;  %v323_v19 = vld [vmem:[#allocation2 + $0x950] sm:$0xff] }
 0x177   :  { %v613_v48 = vpop.f32.mrf.mxu0  ;;  %v918_v49 = vpop.f32.mrf.mxu1  ;;  %v299_v0 = vld [vmem:[#allocation2 + $0x890] sm:$0xff] }
 0x178   :  { %v322_v49 = vld [vmem:[#allocation2 + $0x948] sm:$0xff] }
 0x179   :  { %v2470_v54 = vpop.f32.mrf.mxu0  ;;  %v2472_v55 = vpop.f32.mrf.mxu1  ;;  %1160 = vmatmul.mubr.f32.gmra.mxu1 %v312_v33  ;;  %1902 = vmatmul.mubr.f32.gmra.mxu0 %v284_v34 }
 0x17a   :  { %1164 = vmatprep.mubr.f32.mxu1 %v318_v50  ;;  %1904 = vmatprep.mubr.f32.mxu0 %v289_v51  ;;  %v328_v50 = vld [vmem:[#allocation2 + $0x978] sm:$0xff]  ;;  %v309_v51 = vld [vmem:[#allocation2 + $0x8e0] sm:$0xff] }
 0x17b   :  { %v618_v4 = vpop.f32.mrf.mxu0  ;;  %v923_v7 = vpop.f32.mrf.mxu1 }
 0x17c   :  { %v327_v7 = vld [vmem:[#allocation2 + $0x970] sm:$0xff] }
 0x17d   :  { %v2474_v43 = vpop.f32.mrf.mxu0  ;;  %v2476_v48 = vpop.f32.mrf.mxu1  ;;  %1165 = vmatmul.mubr.f32.gmra.mxu1 %v317_v11  ;;  %1905 = vmatmul.mubr.f32.gmra.mxu0 %v294_v12 }
 0x17e   :  { %1169 = vmatprep.mubr.f32.mxu1 %v323_v19  ;;  %1907 = vmatprep.mubr.f32.mxu0 %v299_v0  ;;  %v333_v19 = vld [vmem:[#allocation2 + $0x9a0] sm:$0xff]  ;;  %v319_v0 = vld [vmem:[#allocation2 + $0x930] sm:$0xff] }
 0x17f   :  { %v623_v33 = vpop.f32.mrf.mxu0  ;;  %v928_v34 = vpop.f32.mrf.mxu1 }
 0x180   :  { %v332_v34 = vld [vmem:[#allocation2 + $0x998] sm:$0xff] }
 0x181   :  { %v2478_v8 = vpop.f32.mrf.mxu0  ;;  %v2480_v4 = vpop.f32.mrf.mxu1  ;;  %1170 = vmatmul.mubr.f32.gmra.mxu1 %v322_v49  ;;  %1908 = vmatmul.mubr.f32.gmra.mxu0 %v304_v31 }
 0x182   :  { %1174 = vmatprep.mubr.f32.mxu1 %v328_v50  ;;  %1910 = vmatprep.mubr.f32.mxu0 %v309_v51  ;;  %v338_v50 = vld [vmem:[#allocation2 + $0x9c8] sm:$0xff]  ;;  %v329_v51 = vld [vmem:[#allocation2 + $0x980] sm:$0xff] }
 0x183   :  { %v628_v11 = vpop.f32.mrf.mxu0  ;;  %v933_v12 = vpop.f32.mrf.mxu1 }
 0x185   :  { %v2482_v47 = vpop.f32.mrf.mxu0  ;;  %v2484_v33 = vpop.f32.mrf.mxu1  ;;  %1175 = vmatmul.mubr.f32.gmra.mxu1 %v327_v7  ;;  %1911 = vmatmul.mubr.f32.gmra.mxu0 %v314_v18  ;;  %v337_v7 = vld [vmem:[#allocation2 + $0x9c0] sm:$0xff]  ;;  %v334_v18 = vld [vmem:[#allocation2 + $0x9a8] sm:$0xff] }
 0x186   :  { %1179 = vmatprep.mubr.f32.mxu1 %v333_v19  ;;  %1913 = vmatprep.mubr.f32.mxu0 %v319_v0 }
 0x187   :  { %v633_v49 = vpop.f32.mrf.mxu0  ;;  %v938_v31 = vpop.f32.mrf.mxu1 }
 0x189   :  { %v2486_v25 = vpop.f32.mrf.mxu0  ;;  %v941_v11 = vpop.f32.mrf.mxu1  ;;  %1180 = vmatmul.mubr.f32.gmra.mxu1 %v332_v34  ;;  %1914 = vmatmul.mubr.f32.gmra.mxu0 %v324_v59  ;;  %v342_v59 = vld [vmem:[#allocation2 + $0x9e8] sm:$0xff] }
 0x18a   :  { %v2489_v12 = vadd.f32 %v941_v11, %v2422_v17  ;;  %1184 = vmatprep.mubr.f32.mxu1 %v338_v50  ;;  %1916 = vmatprep.mubr.f32.mxu0 %v329_v51  ;;  %v344_v17 = vld [vmem:[#allocation2 + $0x9f8] sm:$0xff] }
 0x18b   :  { %v638_v19 = vpop.f32.mrf.mxu0  ;;  %v943_v0 = vpop.f32.mrf.mxu1 }
 0x18d   :  { %v2491_v49 = vpop.f32.mrf.mxu0  ;;  %v946_v31 = vpop.f32.mrf.mxu1  ;;  %1185 = vmatmul.mubr.f32.gmra.mxu1 %v337_v7  ;;  %1917 = vmatmul.mubr.f32.gmra.mxu0 %v334_v18 }
 0x18e   :  { %v2494_v14 = vadd.f32 %v946_v31, %v2426_v30  ;;  %1189 = vmatprep.mubr.f32.mxu1 %v343_v35  ;;  %1919 = vmatprep.mubr.f32.mxu0 %v339_v6 }
 0x18f   :  { %v643_v34 = vpop.f32.mrf.mxu0  ;;  %v948_v50 = vpop.f32.mrf.mxu1 }
 0x191   :  { %v2496_v51 = vpop.f32.mrf.mxu0  ;;  %v951_v11 = vpop.f32.mrf.mxu1  ;;  %1190 = vmatmul.mubr.f32.gmra.mxu1 %v342_v59  ;;  %1920 = vmatmul.mubr.f32.gmra.mxu0 %v344_v17 }
 0x192   :  { %v2499_v19 = vadd.f32 %v951_v11, %v2430_v42 }
 0x193   :  { %v648_v0 = vpop.f32.mrf.mxu0  ;;  %v953_v7 = vpop.f32.mrf.mxu1 }
 0x195   :  { %v2501_v18 = vpop.f32.mrf.mxu0  ;;  %v956_v30 = vpop.f32.mrf.mxu1 }
 0x196   :  { %v2504_v35 = vadd.f32 %v956_v30, %v2434_v57 }
 0x197   :  { %v653_v6 = vpop.f32.mrf.mxu0  ;;  %v958_v31 = vpop.f32.mrf.mxu1 }
 0x199   :  { %v2506_v34 = vpop.f32.mrf.mxu0  ;;  %v961_v50 = vpop.f32.mrf.mxu1 }
 0x19a   :  { %v2509_v53 = vadd.f32 %v961_v50, %v2438_v9 }
 0x19b   :  { %v658_v59 = vpop.f32.mrf.mxu0  ;;  %v963_v17 = vpop.f32.mrf.mxu1 }
 0x19d   :  { %v2511_v42 = vpop.f32.mrf.mxu0  ;;  %v966_v11 = vpop.f32.mrf.mxu1 }
 0x19e   :  { %v2514_v0 = vadd.f32 %v966_v11, %v2442_v23 }
 0x19f   :  { %v663_v7 = vpop.f32.mrf.mxu0  ;;  %v968_v61 = vpop.f32.mrf.mxu1 }
 0x1a1   :  { %v2516_v57 = vpop.f32.mrf.mxu0  ;;  %v971_v30 = vpop.f32.mrf.mxu1 }
 0x1a2   :  { %v2519_v6 = vadd.f32 %v971_v30, %v2446_v40 }
 0x1a3   :  { %v668_v31 = vpop.f32.mrf.mxu0  ;;  %v973_v37 = vpop.f32.mrf.mxu1 }
 0x1a5   :  { %v2521_v9 = vpop.f32.mrf.mxu0  ;;  %v976_v50 = vpop.f32.mrf.mxu1 }
 0x1a6   :  { %2996 = vst [vmem:[#allocation21_spill] sm:$0xff] %v2521_v9  ;;  %v2524_v59 = vadd.f32 %v976_v50, %v2450_v62 }
 0x1a7   :  { %v673_v17 = vpop.f32.mrf.mxu0  ;;  %v978_v45 = vpop.f32.mrf.mxu1 }
 0x1a9   :  { %v2526_v23 = vpop.f32.mrf.mxu0  ;;  %v981_v11 = vpop.f32.mrf.mxu1 }
 0x1aa   :  { %v2529_v61 = vadd.f32 %v981_v11, %v2454_v15 }
 0x1ab   :  { %v678_v7 = vpop.f32.mrf.mxu0  ;;  %v983_v21 = vpop.f32.mrf.mxu1 }
 0x1ad   :  { %v2531_v40 = vpop.f32.mrf.mxu0  ;;  %v986_v30 = vpop.f32.mrf.mxu1 }
 0x1ae   :  { %2997 = vst [vmem:[#allocation22_spill] sm:$0xff] %v2531_v40  ;;  %v2534_v37 = vadd.f32 %v986_v30, %v2458_v38 }
 0x1af   :  { %v683_v31 = vpop.f32.mrf.mxu0  ;;  %v988_v29 = vpop.f32.mrf.mxu1 }
 0x1b1   :  { %v2536_v62 = vpop.f32.mrf.mxu0  ;;  %v991_v50 = vpop.f32.mrf.mxu1 }
 0x1b2   :  { %2998 = vst [vmem:[#allocation23_spill] sm:$0xff] %v2536_v62  ;;  %v2539_v45 = vadd.f32 %v991_v50, %v2462_v1 }
 0x1b3   :  { %v688_v17 = vpop.f32.mrf.mxu0  ;;  %v993_v9 = vpop.f32.mrf.mxu1 }
 0x1b5   :  { %v2541_v15 = vpop.f32.mrf.mxu0  ;;  %v996_v11 = vpop.f32.mrf.mxu1 }
 0x1b6   :  { %2999 = vst [vmem:[#allocation24_spill] sm:$0xff] %v2541_v15  ;;  %v2544_v21 = vadd.f32 %v996_v11, %v2466_v26 }
 0x1b7   :  { %v693_v7 = vpop.f32.mrf.mxu0  ;;  %v998_v40 = vpop.f32.mrf.mxu1 }
 0x1b9   :  { %v2546_v38 = vpop.f32.mrf.mxu0  ;;  %v1001_v30 = vpop.f32.mrf.mxu1 }
 0x1ba   :  { %3000 = vst [vmem:[#allocation25_spill] sm:$0xff] %v2546_v38  ;;  %v2549_v29 = vadd.f32 %v1001_v30, %v2470_v54 }
 0x1bb   :  { %v698_v31 = vpop.f32.mrf.mxu0  ;;  %v1003_v62 = vpop.f32.mrf.mxu1 }
 0x1bd   :  { %v2551_v1 = vpop.f32.mrf.mxu0  ;;  %v1006_v50 = vpop.f32.mrf.mxu1 }
 0x1be   :  { %3001 = vst [vmem:[#allocation26_spill] sm:$0xff] %v2551_v1  ;;  %v2554_v9 = vadd.f32 %v1006_v50, %v2474_v43 }
 0x1bf   :  { %v703_v17 = vpop.f32.mrf.mxu0  ;;  %v1008_v15 = vpop.f32.mrf.mxu1 }
 0x1c1   :  { %v2556_v26 = vpop.f32.mrf.mxu0  ;;  %v1011_v11 = vpop.f32.mrf.mxu1 }
 0x1c2   :  { %3002 = vst [vmem:[#allocation27_spill] sm:$0xff] %v2556_v26  ;;  %v2559_v40 = vadd.f32 %v1011_v11, %v2478_v8 }
 0x1c3   :  { %v708_v7 = vpop.f32.mrf.mxu0  ;;  %v1013_v38 = vpop.f32.mrf.mxu1 }
 0x1c5   :  { %v2561_v54 = vpop.f32.mrf.mxu0  ;;  %v1016_v30 = vpop.f32.mrf.mxu1 }
 0x1c6   :  { %3003 = vst [vmem:[#allocation28_spill] sm:$0xff] %v2561_v54  ;;  %v2564_v62 = vadd.f32 %v1016_v30, %v2482_v47 }
 0x1c7   :  { %v713_v31 = vpop.f32.mrf.mxu0  ;;  %v1018_v1 = vpop.f32.mrf.mxu1 }
 0x1c9   :  { %v2566_v43 = vpop.f32.mrf.mxu0  ;;  %v1021_v50 = vpop.f32.mrf.mxu1 }
 0x1ca   :  { %v2569_v15 = vadd.f32 %v1021_v50, %v2486_v25  ;;  %v882_v25 = vadd.f32 %v2440_v10, %v2374_v28  ;;  %v887_v10 = vadd.f32 %v2444_v24, %v2378_v36 }
 0x1cb   :  { %v718_v17 = vpop.f32.mrf.mxu0  ;;  %v1023_v26 = vpop.f32.mrf.mxu1 }
 0x1cc   :  { %v877_v26 = vadd.f32 %v2436_v58, %v2370_v20 }
 0x1cd   :  { %v2571_v8 = vpop.f32.mrf.mxu0  ;;  %v1026_v11 = vpop.f32.mrf.mxu1 }
 0x1ce   :  { %3004 = vst [vmem:[#allocation29_spill] sm:$0xff] %v2571_v8  ;;  %v2574_v38 = vadd.f32 %v1026_v11, %v2491_v49 }
 0x1cf   :  { %v723_v7 = vpop.f32.mrf.mxu0  ;;  %v1028_v54 = vpop.f32.mrf.mxu1 }
 0x1d0   :  { %v892_v7 = vadd.f32 %v2448_v41, %v2382_v44  ;;  %v902_v44 = vadd.f32 %v2456_v16, %v2390_v60 }
 0x1d1   :  { %v2576_v47 = vpop.f32.mrf.mxu0  ;;  %v2578_v30 = vpop.f32.mrf.mxu1 }
 0x1d2   :  { %3005 = vst [vmem:[#allocation30_spill] sm:$0xff] %v2576_v47 }
 0x1d3   :  { %v728_v1 = vpop.f32.mrf.mxu0  ;;  %v1033_v31 = vpop.f32.mrf.mxu1 }
 0x1d5   :  { %v1036_v50 = vpop.f32.mrf.mxu1  ;;  %v1828_v17 = vpop.f32.mrf.mxu0 }
 0x1d6   :  { %v2585_v8 = vadd.f32 %v1036_v50, %v2501_v18  ;;  %v1267_v49 = vadd.f32 %v1828_v17, %v882_v25  ;;  %v897_v17 = vadd.f32 %v2452_v63, %v2386_v52 }
 0x1d7   :  { %v1038_v54 = vpop.f32.mrf.mxu1  ;;  %v1261_v11 = vpop.f32.mrf.mxu0 }
 0x1d8   :  { %v1581_v1 = vmul.f32 0.1, %v1267_v49  ;;  %v1262_v31 = vadd.f32 %v1261_v11, %v877_v26  ;;  %v912_v54 = vadd.f32 %v2464_v2, %v2398_v13 }
 0x1d9   :  { %v2589_v47 = vpop.f32.mrf.mxu1  ;;  %v1831_v28 = vpop.f32.mrf.mxu0 }
 0x1da   :  { %1646 = vst.msk [vmem:[%s2979_s2 + $0x8] sm:$0xff] %vm1644_vm0, %v1581_v1  ;;  %v1580_v20 = vmul.f32 0.1, %v1262_v31  ;;  %v1277_v58 = vadd.f32 %v1831_v28, %v892_v7  ;;  %v907_v1 = vadd.f32 %v2460_v39, %v2394_v5 }
 0x1db   :  { %v1043_v18 = vpop.f32.mrf.mxu1  ;;  %v1271_v25 = vpop.f32.mrf.mxu0 }
 0x1dc   :  { %1645 = vst.msk [vmem:[%s2979_s2] sm:$0xff] %vm1644_vm0, %v1580_v20  ;;  %v1583_v41 = vmul.f32 0.1, %v1277_v58  ;;  %v1272_v50 = vadd.f32 %v1271_v25, %v887_v10  ;;  %v922_v10 = vadd.f32 %v2472_v55, %v2406_v32  ;;  %v917_v18 = vadd.f32 %v2468_v27, %v2402_v22 }
 0x1dd   :  { %v2603_v36 = vpop.f32.mrf.mxu1  ;;  %v1834_v24 = vpop.f32.mrf.mxu0 }
 0x1de   :  { %1648 = vst.msk [vmem:[%s2979_s2 + $0x18] sm:$0xff] %vm1644_vm0, %v1583_v41  ;;  %v1582_v26 = vmul.f32 0.1, %v1272_v50  ;;  %v1287_v60 = vadd.f32 %v1834_v24, %v902_v44  ;;  %v932_v41 = vadd.f32 %v2480_v4, %v2414_v56 }
 0x1df   :  { %v1048_v16 = vpop.f32.mrf.mxu1  ;;  %v1281_v49 = vpop.f32.mrf.mxu0 }
 0x1e0   :  { %1647 = vst.msk [vmem:[%s2979_s2 + $0x10] sm:$0xff] %vm1644_vm0, %v1582_v26  ;;  %v1585_v11 = vmul.f32 0.1, %v1287_v60  ;;  %v1282_v7 = vadd.f32 %v1281_v49, %v897_v17  ;;  %v927_v17 = vadd.f32 %v2476_v48, %v2410_v46  ;;  %v937_v46 = vadd.f32 %v2484_v33, %v2418_v3 }
 0x1e1   :  { %v2617_v52 = vpop.f32.mrf.mxu1  ;;  %v1837_v63 = vpop.f32.mrf.mxu0 }
 0x1e2   :  { %1650 = vst.msk [vmem:[%s2979_s2 + $0x28] sm:$0xff] %vm1644_vm0, %v1585_v11  ;;  %v1584_v31 = vmul.f32 0.1, %v1282_v7  ;;  %v1297_v13 = vadd.f32 %v1837_v63, %v912_v54 }
 0x1e3   :  { %v1053_v2 = vpop.f32.mrf.mxu1  ;;  %v1291_v28 = vpop.f32.mrf.mxu0 }
 0x1e4   :  { %1649 = vst.msk [vmem:[%s2979_s2 + $0x20] sm:$0xff] %vm1644_vm0, %v1584_v31  ;;  %v1587_v20 = vmul.f32 0.1, %v1297_v13  ;;  %v1292_v58 = vadd.f32 %v1291_v28, %v907_v1 }
 0x1e5   :  { %v2631_v5 = vpop.f32.mrf.mxu1  ;;  %v1840_v39 = vpop.f32.mrf.mxu0 }
 0x1e6   :  { %1652 = vst.msk [vmem:[%s2979_s2 + $0x38] sm:$0xff] %vm1644_vm0, %v1587_v20  ;;  %v1586_v25 = vmul.f32 0.1, %v1292_v58  ;;  %v1307_v32 = vadd.f32 %v1840_v39, %v922_v10 }
 0x1e7   :  { %v1058_v55 = vpop.f32.mrf.mxu1  ;;  %v1301_v44 = vpop.f32.mrf.mxu0 }
 0x1e8   :  { %1651 = vst.msk [vmem:[%s2979_s2 + $0x30] sm:$0xff] %vm1644_vm0, %v1586_v25  ;;  %v1589_v50 = vmul.f32 0.1, %v1307_v32  ;;  %v1302_v24 = vadd.f32 %v1301_v44, %v917_v18 }
 0x1e9   :  { %v2645_v22 = vpop.f32.mrf.mxu1  ;;  %v1843_v27 = vpop.f32.mrf.mxu0 }
 0x1ea   :  { %1654 = vst.msk [vmem:[%s2979_s2 + $0x48] sm:$0xff] %vm1644_vm0, %v1589_v50  ;;  %v1588_v26 = vmul.f32 0.1, %v1302_v24  ;;  %v1317_v56 = vadd.f32 %v1843_v27, %v932_v41 }
 0x1eb   :  { %v1063_v4 = vpop.f32.mrf.mxu1  ;;  %v1311_v60 = vpop.f32.mrf.mxu0 }
 0x1ec   :  { %1653 = vst.msk [vmem:[%s2979_s2 + $0x40] sm:$0xff] %vm1644_vm0, %v1588_v26  ;;  %v1591_v16 = vmul.f32 0.1, %v1317_v56  ;;  %v1312_v49 = vadd.f32 %v1311_v60, %v927_v17 }
 0x1ed   :  { %v2657_v54 = vpop.f32.mrf.mxu1  ;;  %v1846_v11 = vpop.f32.mrf.mxu0 }
 0x1ee   :  { %1656 = vst.msk [vmem:[%s2979_s2 + $0x58] sm:$0xff] %vm1644_vm0, %v1591_v16  ;;  %v1590_v48 = vmul.f32 0.1, %v1312_v49  ;;  %v1327_v7 = vadd.f32 %v1846_v11, %v2489_v12 }
 0x1ef   :  { %v1068_v63 = vpop.f32.mrf.mxu1  ;;  %v1321_v1 = vpop.f32.mrf.mxu0 }
 0x1f0   :  { %1655 = vst.msk [vmem:[%s2979_s2 + $0x50] sm:$0xff] %vm1644_vm0, %v1590_v48  ;;  %v1593_v31 = vmul.f32 0.1, %v1327_v7  ;;  %v1322_v13 = vadd.f32 %v1321_v1, %v937_v46 }
 0x1f1   :  { %v2670_v2 = vpop.f32.mrf.mxu1  ;;  %v1849_v3 = vpop.f32.mrf.mxu0 }
 0x1f2   :  { %1658 = vst.msk [vmem:[%s2979_s2 + $0x68] sm:$0xff] %vm1644_vm0, %v1593_v31  ;;  %v1592_v33 = vmul.f32 0.1, %v1322_v13  ;;  %v1337_v12 = vadd.f32 %v1849_v3, %v2499_v19 }
 0x1f3   :  { %v1073_v28 = vpop.f32.mrf.mxu1  ;;  %v1331_v10 = vpop.f32.mrf.mxu0 }
 0x1f4   :  { %1657 = vst.msk [vmem:[%s2979_s2 + $0x60] sm:$0xff] %vm1644_vm0, %v1592_v33  ;;  %v1595_v20 = vmul.f32 0.1, %v1337_v12  ;;  %v1332_v58 = vadd.f32 %v1331_v10, %v2494_v14 }
 0x1f5   :  { %v2682_v39 = vpop.f32.mrf.mxu1  ;;  %v1852_v18 = vpop.f32.mrf.mxu0 }
 0x1f6   :  { %1660 = vst.msk [vmem:[%s2979_s2 + $0x78] sm:$0xff] %vm1644_vm0, %v1595_v20  ;;  %v1594_v25 = vmul.f32 0.1, %v1332_v58  ;;  %v1347_v19 = vadd.f32 %v1852_v18, %v2509_v53 }
 0x1f7   :  { %v1078_v32 = vpop.f32.mrf.mxu1  ;;  %v1341_v55 = vpop.f32.mrf.mxu0 }
 0x1f8   :  { %1659 = vst.msk [vmem:[%s2979_s2 + $0x70] sm:$0xff] %vm1644_vm0, %v1594_v25  ;;  %v1597_v44 = vmul.f32 0.1, %v1347_v19  ;;  %v1342_v14 = vadd.f32 %v1341_v55, %v2504_v35 }
 0x1f9   :  { %v2694_v41 = vpop.f32.mrf.mxu1  ;;  %v1855_v50 = vpop.f32.mrf.mxu0 }
 0x1fa   :  { %1662 = vst.msk [vmem:[%s2979_s2 + $0x88] sm:$0xff] %vm1644_vm0, %v1597_v44  ;;  %v1596_v24 = vmul.f32 0.1, %v1342_v14  ;;  %v1357_v53 = vadd.f32 %v1855_v50, %v2519_v6 }
 0x1fb   :  { %v1083_v27 = vpop.f32.mrf.mxu1  ;;  %v1351_v17 = vpop.f32.mrf.mxu0 }
 0x1fc   :  { %1661 = vst.msk [vmem:[%s2979_s2 + $0x80] sm:$0xff] %vm1644_vm0, %v1596_v24  ;;  %v1599_v26 = vmul.f32 0.1, %v1357_v53  ;;  %v1352_v35 = vadd.f32 %v1351_v17, %v2514_v0  ;;  %v1032_v53 = vadd.f32 %v2578_v30, %v2496_v51  ;;  %v1042_v30 = vadd.f32 %v2589_v47, %v2506_v34 }
 0x1fd   :  { %v2706_v56 = vpop.f32.mrf.mxu1  ;;  %v1858_v4 = vpop.f32.mrf.mxu0  ;;  %v1052_v47 = vadd.f32 %v2617_v52, %v2516_v57 }
 0x1fe   :  { %1664 = vst.msk [vmem:[%s2979_s2 + $0x98] sm:$0xff] %vm1644_vm0, %v1599_v26  ;;  %v1598_v60 = vmul.f32 0.1, %v1352_v35  ;;  %v1367_v6 = vadd.f32 %v1858_v4, %v2529_v61 }
 0x1ff   :  { %v1088_v16 = vpop.f32.mrf.mxu1  ;;  %v1361_v49 = vpop.f32.mrf.mxu0 }
 0x200   :  { %1663 = vst.msk [vmem:[%s2979_s2 + $0x90] sm:$0xff] %vm1644_vm0, %v1598_v60  ;;  %v1601_v11 = vmul.f32 0.1, %v1367_v6  ;;  %v1362_v0 = vadd.f32 %v1361_v49, %v2524_v59 }
 0x201   :  { %v2718_v46 = vpop.f32.mrf.mxu1  ;;  %v1861_v48 = vpop.f32.mrf.mxu0 }
 0x202   :  { %1666 = vst.msk [vmem:[%s2979_s2 + $0xa8] sm:$0xff] %vm1644_vm0, %v1601_v11  ;;  %v1600_v7 = vmul.f32 0.1, %v1362_v0  ;;  %v1377_v61 = vadd.f32 %v1861_v48, %v2539_v45 }
 0x203   :  { %v1093_v63 = vpop.f32.mrf.mxu1  ;;  %v1371_v1 = vpop.f32.mrf.mxu0 }
 0x204   :  { %1665 = vst.msk [vmem:[%s2979_s2 + $0xa0] sm:$0xff] %vm1644_vm0, %v1600_v7  ;;  %v1603_v31 = vmul.f32 0.1, %v1377_v61  ;;  %v1372_v59 = vadd.f32 %v1371_v1, %v2534_v37  ;;  %v1047_v63 = vadd.f32 %v2603_v36, %v2511_v42 }
 0x205   :  { %v2730_v13 = vpop.f32.mrf.mxu1  ;;  %v1864_v3 = vpop.f32.mrf.mxu0 }
 0x206   :  { %1668 = vst.msk [vmem:[%s2979_s2 + $0xb8] sm:$0xff] %vm1644_vm0, %v1603_v31  ;;  %v1602_v33 = vmul.f32 0.1, %v1372_v59  ;;  %v1387_v45 = vadd.f32 %v1864_v3, %v2549_v29  ;;  %v1062_v59 = vadd.f32 %v2645_v22, %v2526_v23 }
 0x207   :  { %v1098_v12 = vpop.f32.mrf.mxu1  ;;  %v1381_v28 = vpop.f32.mrf.mxu0 }
 0x208   :  { %1667 = vst.msk [vmem:[%s2979_s2 + $0xb0] sm:$0xff] %vm1644_vm0, %v1602_v33  ;;  %v1605_v10 = vmul.f32 0.1, %v1387_v45  ;;  %v1382_v37 = vadd.f32 %v1381_v28, %v2544_v21  ;;  %v3006_v33 = vld [vmem:[#allocation21_spill] sm:$0xff] }
 0x209   :  { %v2742_v20 = vpop.f32.mrf.mxu1  ;;  %v1867_v58 = vpop.f32.mrf.mxu0  ;;  %v1057_v45 = vadd.f32 %v2631_v5, %v3006_v33  ;;  %v3015_v33 = vld [vmem:[#allocation29_spill] sm:$0xff] }
 0x20a   :  { %1670 = vst.msk [vmem:[%s2979_s2 + $0xc8] sm:$0xff] %vm1644_vm0, %v1605_v10  ;;  %v1604_v18 = vmul.f32 0.1, %v1382_v37  ;;  %v1397_v29 = vadd.f32 %v1867_v58, %v2559_v40  ;;  %v3007_v10 = vld [vmem:[#allocation23_spill] sm:$0xff] }
 0x20b   :  { %v1103_v25 = vpop.f32.mrf.mxu1  ;;  %v1391_v19 = vpop.f32.mrf.mxu0  ;;  %v1072_v37 = vadd.f32 %v2670_v2, %v3007_v10 }
 0x20c   :  { %1669 = vst.msk [vmem:[%s2979_s2 + $0xc0] sm:$0xff] %vm1644_vm0, %v1604_v18  ;;  %v1607_v32 = vmul.f32 0.1, %v1397_v29  ;;  %v1392_v21 = vadd.f32 %v1391_v19, %v2554_v9  ;;  %v3008_v25 = vld [vmem:[#allocation22_spill] sm:$0xff] }
 0x20d   :  { %v2754_v55 = vpop.f32.mrf.mxu1  ;;  %v1870_v44 = vpop.f32.mrf.mxu0  ;;  %v1067_v19 = vadd.f32 %v2657_v54, %v3008_v25 }
 0x20e   :  { %1672 = vst.msk [vmem:[%s2979_s2 + $0xd8] sm:$0xff] %vm1644_vm0, %v1607_v32  ;;  %v1606_v14 = vmul.f32 0.1, %v1392_v21  ;;  %v1407_v40 = vadd.f32 %v1870_v44, %v2569_v15 }
 0x20f   :  { %v1108_v50 = vpop.f32.mrf.mxu1  ;;  %v1401_v24 = vpop.f32.mrf.mxu0 }
 0x210   :  { %1671 = vst.msk [vmem:[%s2979_s2 + $0xd0] sm:$0xff] %vm1644_vm0, %v1606_v14  ;;  %v1609_v9 = vmul.f32 0.1, %v1407_v40  ;;  %v1402_v27 = vadd.f32 %v1401_v24, %v2564_v62  ;;  %v3009_v14 = vld [vmem:[#allocation25_spill] sm:$0xff] }
 0x211   :  { %v2768_v17 = vpop.f32.mrf.mxu1  ;;  %v1873_v26 = vpop.f32.mrf.mxu0  ;;  %v1082_v40 = vadd.f32 %v2694_v41, %v3009_v14 }
 0x212   :  { %1674 = vst.msk [vmem:[%s2979_s2 + $0xe8] sm:$0xff] %vm1644_vm0, %v1609_v9  ;;  %v1608_v15 = vmul.f32 0.1, %v1402_v27  ;;  %v1417_v35 = vadd.f32 %v1873_v26, %v1032_v53  ;;  %v3010_v9 = vld [vmem:[#allocation24_spill] sm:$0xff] }
 0x213   :  { %v1113_v4 = vpop.f32.mrf.mxu1  ;;  %v1411_v51 = vpop.f32.mrf.mxu0  ;;  %v1077_v27 = vadd.f32 %v2682_v39, %v3010_v9 }
 0x214   :  { %1673 = vst.msk [vmem:[%s2979_s2 + $0xe0] sm:$0xff] %vm1644_vm0, %v1608_v15  ;;  %v1611_v62 = vmul.f32 0.1, %v1417_v35  ;;  %v1412_v60 = vadd.f32 %v1411_v51, %v2574_v38  ;;  %v3011_v4 = vld [vmem:[#allocation27_spill] sm:$0xff] }
 0x215   :  { %v2781_v6 = vpop.f32.mrf.mxu1  ;;  %v1876_v16 = vpop.f32.mrf.mxu0  ;;  %v1092_v51 = vadd.f32 %v2718_v46, %v3011_v4 }
 0x216   :  { %1676 = vst.msk [vmem:[%s2979_s2 + $0xf8] sm:$0xff] %vm1644_vm0, %v1611_v62  ;;  %v1610_v49 = vmul.f32 0.1, %v1412_v60  ;;  %v1427_v11 = vadd.f32 %v1876_v16, %v1042_v30  ;;  %v3012_v16 = vld [vmem:[#allocation26_spill] sm:$0xff] }
 0x217   :  { %v1118_v0 = vpop.f32.mrf.mxu1  ;;  %v1421_v34 = vpop.f32.mrf.mxu0 }
 0x218   :  { %1675 = vst.msk [vmem:[%s2979_s2 + $0xf0] sm:$0xff] %vm1644_vm0, %v1610_v49  ;;  %v1613_v38 = vmul.f32 0.1, %v1427_v11  ;;  %v1422_v48 = vadd.f32 %v1421_v34, %v2585_v8  ;;  %v1087_v49 = vadd.f32 %v2706_v56, %v3012_v16 }
 0x219   :  { %v2794_v7 = vpop.f32.mrf.mxu1  ;;  %v1879_v61 = vpop.f32.mrf.mxu0 }
 0x21a   :  { %1678 = vst.msk [vmem:[%s2979_s2 + $0x108] sm:$0xff] %vm1644_vm0, %v1613_v38  ;;  %v1612_v57 = vmul.f32 0.1, %v1422_v48  ;;  %v1437_v52 = vadd.f32 %v1879_v61, %v1052_v47  ;;  %v1102_v47 = vadd.f32 %v2742_v20, %v2566_v43 }
 0x21b   :  { %v1123_v1 = vpop.f32.mrf.mxu1  ;;  %v1431_v31 = vpop.f32.mrf.mxu0 }
 0x21c   :  { %1677 = vst.msk [vmem:[%s2979_s2 + $0x100] sm:$0xff] %vm1644_vm0, %v1612_v57  ;;  %v1615_v8 = vmul.f32 0.1, %v1437_v52  ;;  %v1432_v3 = vadd.f32 %v1431_v31, %v1047_v63  ;;  %v3013_v63 = vld [vmem:[#allocation28_spill] sm:$0xff]  ;;  %v3014_v31 = vld [vmem:[#allocation30_spill] sm:$0xff] }
 0x21d   :  { %v2808_v42 = vpop.f32.mrf.mxu1  ;;  %v1882_v36 = vpop.f32.mrf.mxu0  ;;  %v1097_v57 = vadd.f32 %v2730_v13, %v3013_v63 }
 0x21e   :  { %1680 = vst.msk [vmem:[%s2979_s2 + $0x118] sm:$0xff] %vm1644_vm0, %v1615_v8  ;;  %v1614_v12 = vmul.f32 0.1, %v1432_v3  ;;  %v1447_v23 = vadd.f32 %v1882_v36, %v1062_v59  ;;  %v1112_v59 = vadd.f32 %v2768_v17, %v3014_v31 }
 0x21f   :  { %v1128_v22 = vpop.f32.mrf.mxu1  ;;  %v1441_v28 = vpop.f32.mrf.mxu0 }
 0x220   :  { %1679 = vst.msk [vmem:[%s2979_s2 + $0x110] sm:$0xff] %vm1644_vm0, %v1614_v12  ;;  %v1617_v58 = vmul.f32 0.1, %v1447_v23  ;;  %v1442_v18 = vadd.f32 %v1441_v28, %v1057_v45  ;;  %v1107_v45 = vadd.f32 %v2754_v55, %v3015_v33  ;;  %v3016_v28 = vld [vmem:[#allocation6_spill] sm:$0xff] }
 0x221   :  { %v2822_v5 = vpop.f32.mrf.mxu1  ;;  %v1885_v29 = vpop.f32.mrf.mxu0  ;;  %v1122_v10 = vadd.f32 %v2794_v7, %v3016_v28 }
 0x222   :  { %1682 = vst.msk [vmem:[%s2979_s2 + $0x128] sm:$0xff] %vm1644_vm0, %v1617_v58  ;;  %v1616_v32 = vmul.f32 0.1, %v1442_v18  ;;  %v1457_v2 = vadd.f32 %v1885_v29, %v1072_v37  ;;  %v3017_v29 = vld [vmem:[#allocation5_spill] sm:$0xff] }
 0x223   :  { %v1133_v21 = vpop.f32.mrf.mxu1  ;;  %v1451_v44 = vpop.f32.mrf.mxu0  ;;  %v1117_v25 = vadd.f32 %v2781_v6, %v3017_v29 }
 0x224   :  { %1681 = vst.msk [vmem:[%s2979_s2 + $0x120] sm:$0xff] %vm1644_vm0, %v1616_v32  ;;  %v1619_v50 = vmul.f32 0.1, %v1457_v2  ;;  %v1452_v24 = vadd.f32 %v1451_v44, %v1067_v19  ;;  %v3018_v21 = vld [vmem:[#allocation8_spill] sm:$0xff] }
 0x225   :  { %v2836_v54 = vpop.f32.mrf.mxu1  ;;  %v1888_v53 = vpop.f32.mrf.mxu0  ;;  %v1132_v44 = vadd.f32 %v2822_v5, %v3018_v21 }
 0x226   :  { %1684 = vst.msk [vmem:[%s2979_s2 + $0x138] sm:$0xff] %vm1644_vm0, %v1619_v50  ;;  %v1618_v26 = vmul.f32 0.1, %v1452_v24  ;;  %v1467_v41 = vadd.f32 %v1888_v53, %v1082_v40  ;;  %v3019_v24 = vld [vmem:[#allocation7_spill] sm:$0xff] }
 0x227   :  { %v1138_v15 = vpop.f32.mrf.mxu1  ;;  %v1461_v35 = vpop.f32.mrf.mxu0  ;;  %v1127_v53 = vadd.f32 %v2808_v42, %v3019_v24 }
 0x228   :  { %1683 = vst.msk [vmem:[%s2979_s2 + $0x130] sm:$0xff] %vm1644_vm0, %v1618_v26  ;;  %v1621_v30 = vmul.f32 0.1, %v1467_v41  ;;  %v1462_v62 = vadd.f32 %v1461_v35, %v1077_v27  ;;  %v3020_v41 = vld [vmem:[#allocation10_spill] sm:$0xff] }
 0x229   :  { %v1141_v39 = vpop.f32.mrf.mxu1  ;;  %v1891_v60 = vpop.f32.mrf.mxu0 }
 0x22a   :  { %1686 = vst.msk [vmem:[%s2979_s2 + $0x148] sm:$0xff] %vm1644_vm0, %v1621_v30  ;;  %v1620_v11 = vmul.f32 0.1, %v1462_v62  ;;  %v1477_v0 = vadd.f32 %v1891_v60, %v1092_v51  ;;  %v1142_v15 = vadd.f32 %v1141_v39, %v3020_v41  ;;  %v3021_v30 = vld [vmem:[#allocation9_spill] sm:$0xff]  ;;  %v3030_v41 = vld [vmem:[#allocation19_spill] sm:$0xff] }
 0x22b   :  { %v1143_v46 = vpop.f32.mrf.mxu1  ;;  %v1471_v34 = vpop.f32.mrf.mxu0  ;;  %v1137_v62 = vadd.f32 %v2836_v54, %v3021_v30 }
 0x22c   :  { %1685 = vst.msk [vmem:[%s2979_s2 + $0x140] sm:$0xff] %vm1644_vm0, %v1620_v11  ;;  %v1623_v38 = vmul.f32 0.1, %v1477_v0  ;;  %v1472_v48 = vadd.f32 %v1471_v34, %v1087_v49  ;;  %v3022_v11 = vld [vmem:[#allocation12_spill] sm:$0xff] }
 0x22d   :  { %v1146_v56 = vpop.f32.mrf.mxu1  ;;  %v1894_v61 = vpop.f32.mrf.mxu0 }
 0x22e   :  { %1688 = vst.msk [vmem:[%s2979_s2 + $0x158] sm:$0xff] %vm1644_vm0, %v1623_v38  ;;  %v1622_v52 = vmul.f32 0.1, %v1472_v48  ;;  %v1487_v1 = vadd.f32 %v1894_v61, %v1102_v47  ;;  %v3023_v38 = vld [vmem:[#allocation11_spill] sm:$0xff] }
 0x22f   :  { %v1148_v43 = vpop.f32.mrf.mxu1  ;;  %v1481_v20 = vpop.f32.mrf.mxu0  ;;  %v1147_v48 = vadd.f32 %v1146_v56, %v3023_v38 }
 0x230   :  { %1687 = vst.msk [vmem:[%s2979_s2 + $0x150] sm:$0xff] %vm1644_vm0, %v1622_v52  ;;  %v1625_v8 = vmul.f32 0.1, %v1487_v1  ;;  %v1482_v3 = vadd.f32 %v1481_v20, %v1097_v57  ;;  %v3024_v1 = vld [vmem:[#allocation14_spill] sm:$0xff] }
 0x231   :  { %v1151_v13 = vpop.f32.mrf.mxu1  ;;  %v1897_v36 = vpop.f32.mrf.mxu0 }
 0x232   :  { %1690 = vst.msk [vmem:[%s2979_s2 + $0x168] sm:$0xff] %vm1644_vm0, %v1625_v8  ;;  %v1624_v12 = vmul.f32 0.1, %v1482_v3  ;;  %v1497_v23 = vadd.f32 %v1897_v36, %v1112_v59  ;;  %v1152_v0 = vadd.f32 %v1151_v13, %v3022_v11  ;;  %v3025_v8 = vld [vmem:[#allocation13_spill] sm:$0xff] }
 0x233   :  { %v1153_v17 = vpop.f32.mrf.mxu1  ;;  %v1491_v22 = vpop.f32.mrf.mxu0 }
 0x234   :  { %1689 = vst.msk [vmem:[%s2979_s2 + $0x160] sm:$0xff] %vm1644_vm0, %v1624_v12  ;;  %v1627_v37 = vmul.f32 0.1, %v1497_v23  ;;  %v1492_v58 = vadd.f32 %v1491_v22, %v1107_v45  ;;  %v3026_v12 = vld [vmem:[#allocation16_spill] sm:$0xff] }
 0x235   :  { %v1156_v55 = vpop.f32.mrf.mxu1  ;;  %v1900_v18 = vpop.f32.mrf.mxu0 }
 0x236   :  { %1692 = vst.msk [vmem:[%s2979_s2 + $0x178] sm:$0xff] %vm1644_vm0, %v1627_v37  ;;  %v1626_v19 = vmul.f32 0.1, %v1492_v58  ;;  %v1507_v32 = vadd.f32 %v1900_v18, %v1122_v10  ;;  %v1157_v3 = vadd.f32 %v1156_v55, %v3025_v8  ;;  %v3027_v37 = vld [vmem:[#allocation15_spill] sm:$0xff] }
 0x237   :  { %v1158_v7 = vpop.f32.mrf.mxu1  ;;  %v1501_v2 = vpop.f32.mrf.mxu0 }
 0x238   :  { %1691 = vst.msk [vmem:[%s2979_s2 + $0x170] sm:$0xff] %vm1644_vm0, %v1626_v19  ;;  %v1629_v14 = vmul.f32 0.1, %v1507_v32  ;;  %v1502_v40 = vadd.f32 %v1501_v2, %v1117_v25  ;;  %v3028_v19 = vld [vmem:[#allocation18_spill] sm:$0xff] }
 0x239   :  { %v1161_v6 = vpop.f32.mrf.mxu1  ;;  %v1903_v50 = vpop.f32.mrf.mxu0 }
 0x23a   :  { %1694 = vst.msk [vmem:[%s2979_s2 + $0x188] sm:$0xff] %vm1644_vm0, %v1629_v14  ;;  %v1628_v9 = vmul.f32 0.1, %v1502_v40  ;;  %v1517_v27 = vadd.f32 %v1903_v50, %v1132_v44  ;;  %v1162_v43 = vadd.f32 %v1161_v6, %v3024_v1  ;;  %v3029_v14 = vld [vmem:[#allocation17_spill] sm:$0xff] }
 0x23b   :  { %v1163_v5 = vpop.f32.mrf.mxu1  ;;  %v1511_v26 = vpop.f32.mrf.mxu0 }
 0x23c   :  { %1693 = vst.msk [vmem:[%s2979_s2 + $0x180] sm:$0xff] %vm1644_vm0, %v1628_v9  ;;  %v1631_v35 = vmul.f32 0.1, %v1517_v27  ;;  %v1512_v4 = vadd.f32 %v1511_v26, %v1127_v53 }
 0x23d   :  { %v1166_v51 = vpop.f32.mrf.mxu1  ;;  %v1906_v42 = vpop.f32.mrf.mxu0 }
 0x23e   :  { %1696 = vst.msk [vmem:[%s2979_s2 + $0x198] sm:$0xff] %vm1644_vm0, %v1631_v35  ;;  %v1630_v60 = vmul.f32 0.1, %v1512_v4  ;;  %v1527_v16 = vadd.f32 %v1906_v42, %v1142_v15  ;;  %v1167_v58 = vadd.f32 %v1166_v51, %v3027_v37  ;;  %v3031_v4 = vld [vmem:[#allocation20_spill] sm:$0xff] }
 0x23f   :  { %v1168_v39 = vpop.f32.mrf.mxu1  ;;  %v1521_v49 = vpop.f32.mrf.mxu0 }
 0x240   :  { %1695 = vst.msk [vmem:[%s2979_s2 + $0x190] sm:$0xff] %vm1644_vm0, %v1630_v60  ;;  %v1633_v46 = vmul.f32 0.1, %v1527_v16  ;;  %v1522_v34 = vadd.f32 %v1521_v49, %v1137_v62 }
 0x241   :  { %v1171_v47 = vpop.f32.mrf.mxu1  ;;  %v1909_v54 = vpop.f32.mrf.mxu0 }
 0x242   :  { %1698 = vst.msk [vmem:[%s2979_s2 + $0x1a8] sm:$0xff] %vm1644_vm0, %v1633_v46  ;;  %v1632_v61 = vmul.f32 0.1, %v1522_v34  ;;  %v1537_v63 = vadd.f32 %v1909_v54, %v1152_v0  ;;  %v1172_v23 = vadd.f32 %v1171_v47, %v3026_v12 }
 0x243   :  { %v1173_v57 = vpop.f32.mrf.mxu1  ;;  %v1531_v52 = vpop.f32.mrf.mxu0 }
 0x244   :  { %1697 = vst.msk [vmem:[%s2979_s2 + $0x1a0] sm:$0xff] %vm1644_vm0, %v1632_v61  ;;  %v1635_v20 = vmul.f32 0.1, %v1537_v63  ;;  %v1532_v31 = vadd.f32 %v1531_v52, %v1147_v48 }
 0x245   :  { %v1176_v59 = vpop.f32.mrf.mxu1  ;;  %v1912_v56 = vpop.f32.mrf.mxu0 }
 0x246   :  { %1700 = vst.msk [vmem:[%s2979_s2 + $0x1b8] sm:$0xff] %vm1644_vm0, %v1635_v20  ;;  %v1634_v13 = vmul.f32 0.1, %v1532_v31  ;;  %v1547_v36 = vadd.f32 %v1912_v56, %v1162_v43  ;;  %v1177_v40 = vadd.f32 %v1176_v59, %v3029_v14 }
 0x247   :  { %v1178_v33 = vpop.f32.mrf.mxu1  ;;  %v1541_v45 = vpop.f32.mrf.mxu0 }
 0x248   :  { %1699 = vst.msk [vmem:[%s2979_s2 + $0x1b0] sm:$0xff] %vm1644_vm0, %v1634_v13  ;;  %v1637_v17 = vmul.f32 0.1, %v1547_v36  ;;  %v1542_v22 = vadd.f32 %v1541_v45, %v1157_v3 }
 0x249   :  { %v1181_v28 = vpop.f32.mrf.mxu1  ;;  %v1915_v10 = vpop.f32.mrf.mxu0 }
 0x24a   :  { %1702 = vst.msk [vmem:[%s2979_s2 + $0x1c8] sm:$0xff] %vm1644_vm0, %v1637_v17  ;;  %v1636_v55 = vmul.f32 0.1, %v1542_v22  ;;  %v1557_v18 = vadd.f32 %v1915_v10, %v1172_v23  ;;  %v1182_v32 = vadd.f32 %v1181_v28, %v3028_v19 }
 0x24b   :  { %v1183_v29 = vpop.f32.mrf.mxu1  ;;  %v1551_v25 = vpop.f32.mrf.mxu0 }
 0x24c   :  { %1701 = vst.msk [vmem:[%s2979_s2 + $0x1c0] sm:$0xff] %vm1644_vm0, %v1636_v55  ;;  %v1639_v7 = vmul.f32 0.1, %v1557_v18  ;;  %v1552_v2 = vadd.f32 %v1551_v25, %v1167_v58 }
 0x24d   :  { %v1186_v21 = vpop.f32.mrf.mxu1  ;;  %v1918_v44 = vpop.f32.mrf.mxu0 }
 0x24e   :  { %1704 = vst.msk [vmem:[%s2979_s2 + $0x1d8] sm:$0xff] %vm1644_vm0, %v1639_v7  ;;  %v1638_v6 = vmul.f32 0.1, %v1552_v2  ;;  %v1567_v50 = vadd.f32 %v1918_v44, %v1182_v32  ;;  %v1187_v15 = vadd.f32 %v1186_v21, %v3030_v41 }
 0x24f   :  { %v1188_v24 = vpop.f32.mrf.mxu1  ;;  %v1561_v53 = vpop.f32.mrf.mxu0 }
 0x250   :  { %1703 = vst.msk [vmem:[%s2979_s2 + $0x1d0] sm:$0xff] %vm1644_vm0, %v1638_v6  ;;  %v1641_v9 = vmul.f32 0.1, %v1567_v50  ;;  %v1562_v27 = vadd.f32 %v1561_v53, %v1177_v40 }
 0x251   :  { %v1191_v5 = vpop.f32.mrf.mxu1  ;;  %v1921_v26 = vpop.f32.mrf.mxu0 }
 0x252   :  { %1706 = vst.msk [vmem:[%s2979_s2 + $0x1e8] sm:$0xff] %vm1644_vm0, %v1641_v9  ;;  %v1640_v35 = vmul.f32 0.1, %v1562_v27  ;;  %v1192_v51 = vadd.f32 %v1191_v5, %v3031_v4 }
 0x253   :  { %v1193_v42 = vpop.f32.mrf.mxu1  ;;  %v1571_v30 = vpop.f32.mrf.mxu0 }
 0x254   :  { %1705 = vst.msk [vmem:[%s2979_s2 + $0x1e0] sm:$0xff] %vm1644_vm0, %v1640_v35  ;;  %v1577_v62 = vadd.f32 %v1921_v26, %v1192_v51  ;;  %v1572_v60 = vadd.f32 %v1571_v30, %v1187_v15 }
 0x256   :  { %v1643_v16 = vmul.f32 0.1, %v1577_v62  ;;  %v1642_v39 = vmul.f32 0.1, %v1572_v60 }
 0x258   :  { %1708 = vst.msk [vmem:[%s2979_s2 + $0x1f8] sm:$0xff] %vm1644_vm0, %v1643_v16  ;;  %1707 = vst.msk [vmem:[%s2979_s2 + $0x1f0] sm:$0xff] %vm1644_vm0, %v1642_v39 }
 0x259   :  { %1713 = vsyncpa [#allocation3], 1 }

</bundles_post_ra>
